<compile_context>
chip_gen: v7x
topology: tpu7x:2x2x1
jax: 0.10.0
libtpu: 0.0.40
codegen_flags: <defaults>
</compile_context>

<pallas_src>
import jax
import jax.numpy as jnp
from jax.experimental import pallas as pl
from jax.experimental.pallas import tpu as pltpu

LEAKY_SLOPE = 0.01                       # F.leaky_relu default negative_slope
BN_EPS = 1e-5                            # BatchNorm1d eps
BN_SCALE = 1.0 / (1.0 + BN_EPS) ** 0.5   # eval-mode BN fold with init stats
HIDDEN = 64                              # hidden_channels


# ----------------------------------------------------------------------------
# pallas_call plumbing: one single-block kernel, full-array specs, grid=(1,)
# ----------------------------------------------------------------------------
def _full_spec(shape):
    nd = len(shape)
    return pl.BlockSpec(shape, lambda i, nd=nd: (0,) * nd)


# contract dim 0 of both operands (transposed-LHS matmul, no materialised .T)
_DN_T = (((0,), (0,)), ((), ()))


# ----------------------------------------------------------------------------
# The fused kernel
# ----------------------------------------------------------------------------
def _fused_kernel(
    # data
    x_lig_ref, x_pro_ref, edge_attr_ref,
    src_ref, dst_ref,            # ligand->protein edges ([E,1] each)
    rsrc_ref, rdst_ref,          # protein->ligand (reverse) edges ([Er,1])
    ebatch_ref,                  # graph id per forward edge ([E,1])
    # fused SAGEConv params: 3 layers x (lp, pl) x ([Wl;Wr] bf16, b_l f32)
    w1lp_ref, b1lp_ref, w1pl_ref, b1pl_ref,
    w2lp_ref, b2lp_ref, w2pl_ref, b2pl_ref,
    w3lp_ref, b3lp_ref, w3pl_ref, b3pl_ref,
    # edge MLP: merged layer-1 (lig|pro rows, BN-folded), folded edge path,
    # layer 2 (BN-folded), layer 3, gated-pooling linear
    w12_ref, foldw_ref, foldb_ref,
    wm2_ref, bm2_ref, wm3_ref, bm3_ref,
    wmpl_ref, bmpl_ref,
    # output [B, 32]
    out_ref,
):
    f32, bf16 = jnp.float32, jnp.bfloat16
    n_lig = x_lig_ref.shape[0]
    n_pro = x_pro_ref.shape[0]
    n_edge = src_ref.shape[0]
    n_redge = rsrc_ref.shape[0]
    num_graphs = out_ref.shape[0]

    def onehot(idx_col, rows, cols):
        it = jax.lax.broadcasted_iota(jnp.int32, (rows, cols), 1)
        return (it == idx_col).astype(bf16)

    # One orientation per index vector; transposed uses go through dot_general.
    oh_src = onehot(src_ref[...], n_edge, n_lig)       # [E,  N_lig]
    oh_dst = onehot(dst_ref[...], n_edge, n_pro)       # [E,  N_pro]
    oh_rsrc = onehot(rsrc_ref[...], n_redge, n_pro)    # [Er, N_pro]
    oh_rdst = onehot(rdst_ref[...], n_redge, n_lig)    # [Er, N_lig]

    def mean_adj(oh_d, oh_s):
        # cnt[d, s] = #edges (s -> d), via transposed-LHS contraction over E
        cnt = jax.lax.dot_general(oh_d, oh_s, _DN_T, preferred_element_type=f32)
        deg = jnp.sum(cnt, axis=1, keepdims=True)
        return (cnt / jnp.maximum(deg, 1.0)).astype(bf16)

    # Dense mean adjacencies, built once and reused by all 3 conv layers.
    # TODO(synk): for E >> hidden switch to the edge-space aggregation form
    # (per-layer gather/scatter) instead of materialising [N,N] state.
    a_lp = mean_adj(oh_dst, oh_src)      # [N_pro, N_lig]
    a_pl = mean_adj(oh_rdst, oh_rsrc)    # [N_lig, N_pro]

    def sage(a_mean, x_src_bf, x_dst_bf, w_ref, b_ref):
        # SAGEConv(mean): [mean_j x_src | x_dst] @ [Wl ; Wr] + b, fused LeakyReLU
        agg = jnp.dot(a_mean, x_src_bf, preferred_element_type=f32)
        xin = jnp.concatenate([agg.astype(bf16), x_dst_bf], axis=1)
        h = jnp.dot(xin, w_ref[...], preferred_element_type=f32) + b_ref[...]
        return jnp.where(h > 0, h, LEAKY_SLOPE * h)

    xl0 = x_lig_ref[...].astype(bf16)
    xp0 = x_pro_ref[...].astype(bf16)
    xp1 = sage(a_lp, xl0, xp0, w1lp_ref, b1lp_ref)
    xl1 = sage(a_pl, xp0, xl0, w1pl_ref, b1pl_ref)
    xl1b, xp1b = xl1.astype(bf16), xp1.astype(bf16)
    xp2 = sage(a_lp, xl1b, xp1b, w2lp_ref, b2lp_ref)
    xl2 = sage(a_pl, xp1b, xl1b, w2pl_ref, b2pl_ref)
    xl2b, xp2b = xl2.astype(bf16), xp2.astype(bf16)
    xp3 = sage(a_lp, xl2b, xp2b, w3lp_ref, b3lp_ref)
    xl3 = sage(a_pl, xp2b, xl2b, w3pl_ref, b3pl_ref)
    xl = (xl1 + xl2 + xl3).astype(bf16)      # residual sums
    xp = (xp1 + xp2 + xp3).astype(bf16)

    # Per-edge gathers via one-hot matmuls, lane-concat to a single K=128 op.
    xl_e = jnp.dot(oh_src, xl, preferred_element_type=f32)      # [E, H]
    xp_e = jnp.dot(oh_dst, xp, preferred_element_type=f32)      # [E, H]
    x_e = jnp.concatenate([xl_e.astype(bf16), xp_e.astype(bf16)], axis=1)  # [E,128]

    # MLP layer 1 (BN folded into weights) + folded edge_lin path on the VPU.
    h = (jnp.dot(x_e, w12_ref[...], preferred_element_type=f32)
         + edge_attr_ref[...] * foldw_ref[...] + foldb_ref[...])
    h = jnp.maximum(h, 0.0)
    h = jnp.dot(h.astype(bf16), wm2_ref[...], preferred_element_type=f32) + bm2_ref[...]
    h = jnp.maximum(h, 0.0)
    m = jnp.dot(h.astype(bf16), wm3_ref[...], preferred_element_type=f32) + bm3_ref[...]  # [E,16]

    # Gated pooling
    gate = jnp.tanh(jnp.dot(m.astype(bf16), wmpl_ref[...],
                            preferred_element_type=f32) + bmpl_ref[...])
    m_w = gate * m                                               # [E, 16] f32

    # Segment-sum per graph as one MXU matmul: e2g^T @ m_w  (f32 for exact sum)
    e2g = (jax.lax.broadcasted_iota(jnp.int32, (n_edge, num_graphs), 1)
           == ebatch_ref[...]).astype(f32)                       # [E, B]
    m_sum = jax.lax.dot_general(e2g, m_w, _DN_T, preferred_element_type=f32)  # [B,16]
    out_ref[:, 0:16] = m_sum

    # Segment-max per graph: masked sublane reductions (B is small & static),
    # written straight into the output lane slice (no concat epilogue).
    for b in range(num_graphs):
        sel = ebatch_ref[...] == b                               # [E, 1]
        mx = jnp.max(jnp.where(sel, m, -3.0e38), axis=0, keepdims=True)   # [1,16]
        has_edge = jnp.max(sel.astype(f32)) > 0.5
        # TODO(synk): empty-segment fill uses 0 (finite) rather than -inf.
        out_ref[b:b + 1, 16:32] = jnp.where(has_edge, mx, jnp.zeros_like(mx))


# ----------------------------------------------------------------------------
# Deterministic parameter init (synthetic; shapes follow the module __init__)
# ----------------------------------------------------------------------------
def _glorot(key, fan_in, fan_out):
    a = (6.0 / (fan_in + fan_out)) ** 0.5
    return jax.random.uniform(key, (fan_in, fan_out), jnp.float32, -a, a)


def init_params(key, f_lig, f_pro, hidden=HIDDEN):
    keys = iter(jax.random.split(key, 64))

    def lin_p(fi, fo, bias=True):
        w = _glorot(next(keys), fi, fo)
        b = (0.1 * jax.random.normal(next(keys), (1, fo), jnp.float32)
             if bias else jnp.zeros((1, fo), jnp.float32))
        return {"w": w, "b": b}

    def sage_p(f_src, f_dst):
        l = lin_p(f_src, hidden, bias=True)    # lin_l (neighbours, with bias)
        r = lin_p(f_dst, hidden, bias=False)   # lin_r (root, no bias)
        return {"wl": l["w"], "bl": l["b"], "wr": r["w"]}

    return {
        "conv1": {"lp": sage_p(f_lig, f_pro), "pl": sage_p(f_pro, f_lig)},
        "conv2": {"lp": sage_p(hidden, hidden), "pl": sage_p(hidden, hidden)},
        "conv3": {"lp": sage_p(hidden, hidden), "pl": sage_p(hidden, hidden)},
        "edge_lin": lin_p(1, 8),
        "mlp1": lin_p(2 * hidden + 8, 512),
        "mlp2": lin_p(512, 64),
        "mlp3": lin_p(64, 16),
        "lin_mpl": lin_p(16, 16),
    }


# ----------------------------------------------------------------------------
# Forward pass: one fused pallas_call; wrapper folds/stacks weights & indices
# ----------------------------------------------------------------------------
def hetero_gnn_forward(params, x_lig, x_pro, edge_index_lp, edge_index_pl,
                       edge_attr_lp, batch_lig, num_graphs):
    src, dst = edge_index_lp        # ligand -> protein
    rsrc, rdst = edge_index_pl      # protein -> ligand (reverse relation)

    i32 = jnp.int32
    src_col = src.astype(i32).reshape(-1, 1)
    dst_col = dst.astype(i32).reshape(-1, 1)
    rsrc_col = rsrc.astype(i32).reshape(-1, 1)
    rdst_col = rdst.astype(i32).reshape(-1, 1)
    # per-edge graph id = batch_lig[src]  (tiny XLA int gather, done once)
    ebatch_col = jnp.take(batch_lig.astype(i32), src.astype(i32)).reshape(-1, 1)

    bf = lambda w: w.astype(jnp.bfloat16)

    args = [
        x_lig.astype(jnp.float32), x_pro.astype(jnp.float32),
        edge_attr_lp.astype(jnp.float32),
        src_col, dst_col, rsrc_col, rdst_col, ebatch_col,
    ]
    # Fused SAGEConv weights: stack [Wl ; Wr] so each direction is one matmul.
    for layer in ("conv1", "conv2", "conv3"):
        for direction in ("lp", "pl"):
            p = params[layer][direction]
            args += [bf(jnp.concatenate([p["wl"], p["wr"]], axis=0)), p["bl"]]

    # Edge MLP layer 1: merged lig|pro rows, BN scale folded, edge path folded.
    w1 = params["mlp1"]["w"]                 # [136, 512]
    b1 = params["mlp1"]["b"]                 # [1, 512]
    wel = params["edge_lin"]["w"]            # [1, 8]
    bel = params["edge_lin"]["b"]            # [1, 8]
    w1c = w1[2 * HIDDEN:]                    # [8, 512]  (edge rows)
    w12 = w1[:2 * HIDDEN] * BN_SCALE         # [128, 512]
    fold_w = (wel @ w1c) * BN_SCALE          # [1, 512]
    fold_b = (bel @ w1c + b1) * BN_SCALE     # [1, 512]
    args += [bf(w12), fold_w, fold_b]
    args += [bf(params["mlp2"]["w"] * BN_SCALE), params["mlp2"]["b"] * BN_SCALE]
    args += [bf(params["mlp3"]["w"]), params["mlp3"]["b"]]
    args += [bf(params["lin_mpl"]["w"]), params["lin_mpl"]["b"]]

    out_shape = jax.ShapeDtypeStruct((num_graphs, 32), jnp.float32)

    # Advisory cost estimate (MXU flops dominated by the [E,128]x[128,512] op).
    n_lig, n_pro = x_lig.shape[0], x_pro.shape[0]
    n_edge, n_redge = src_col.shape[0], rsrc_col.shape[0]
    H = HIDDEN
    flops = 2 * (
        n_pro * n_lig * (n_edge + n_redge)
        + 3 * 2 * n_pro * n_lig * H
        + 3 * (n_pro + n_lig) * 2 * H * H
        + n_edge * (n_lig + n_pro) * H
        + n_edge * (2 * H * 512 + 512 * 64 + 64 * 16 + 16 * 16)
        + num_graphs * n_edge * 16)
    bytes_accessed = int(sum(int(a.size) * a.dtype.itemsize for a in args)
                         + num_graphs * 32 * 4)
    cost = pl.CostEstimate(flops=int(flops), transcendentals=int(n_edge * 16),
                           bytes_accessed=bytes_accessed)

    return pl.pallas_call(
        _fused_kernel,
        out_shape=out_shape,
        grid=(1,),
        in_specs=[_full_spec(a.shape) for a in args],
        out_specs=_full_spec(out_shape.shape),
        compiler_params=pltpu.CompilerParams(
            dimension_semantics=("arbitrary",),
            vmem_limit_bytes=32 * 1024 * 1024),
        cost_estimate=cost,
    )(*args)


# ----------------------------------------------------------------------------
if __name__ == "__main__":
    key = jax.random.PRNGKey(0)
    k_param, k_xl, k_xp, k_e1, k_e2, k_e3, k_e4, k_attr = jax.random.split(key, 8)

    N_LIG, N_PRO = 16, 16
    F_LIG, F_PRO = 8, 8
    E_LP = 32
    NUM_GRAPHS = 2

    x_lig = jax.random.normal(k_xl, (N_LIG, F_LIG), jnp.float32)
    x_pro = jax.random.normal(k_xp, (N_PRO, F_PRO), jnp.float32)

    # Batched graph: nodes 0..7 belong to graph 0, nodes 8..15 to graph 1.
    # Edges stay inside their graph so every graph owns at least one edge.
    half = E_LP // 2
    src_lp = jnp.concatenate([jax.random.randint(k_e1, (half,), 0, N_LIG // 2),
                              jax.random.randint(k_e2, (half,), N_LIG // 2, N_LIG)])
    dst_lp = jnp.concatenate([jax.random.randint(k_e3, (half,), 0, N_PRO // 2),
                              jax.random.randint(k_e4, (half,), N_PRO // 2, N_PRO)])
    # reverse edge type ('protein', 'rev_to', 'ligand')
    src_pl, dst_pl = dst_lp, src_lp

    edge_attr = jax.random.normal(k_attr, (E_LP, 1), jnp.float32)
    batch_lig = jnp.concatenate([jnp.zeros(N_LIG // 2, jnp.int32),
                                 jnp.ones(N_LIG // 2, jnp.int32)])

    params = init_params(k_param, F_LIG, F_PRO)

    out = hetero_gnn_forward(params, x_lig, x_pro,
                             (src_lp, dst_lp), (src_pl, dst_pl),
                             edge_attr, batch_lig, NUM_GRAPHS)
    out = jax.block_until_ready(out)
    assert out.shape == (NUM_GRAPHS, 32) and bool(jnp.all(jnp.isfinite(out)))
    print("KERNEL_OK")
</pallas_src>

<mosaic_0001>
module attributes {stable_mosaic.version = 11 : i64} {
  func.func @_fused_kernel(%arg0: i32, %arg1: memref<16x8xf32, #tpu.memory_space<vmem>>, %arg2: memref<16x8xf32, #tpu.memory_space<vmem>>, %arg3: memref<32x1xf32, #tpu.memory_space<vmem>>, %arg4: memref<32x1xi32, #tpu.memory_space<vmem>>, %arg5: memref<32x1xi32, #tpu.memory_space<vmem>>, %arg6: memref<32x1xi32, #tpu.memory_space<vmem>>, %arg7: memref<32x1xi32, #tpu.memory_space<vmem>>, %arg8: memref<32x1xi32, #tpu.memory_space<vmem>>, %arg9: memref<16x64xbf16, #tpu.memory_space<vmem>>, %arg10: memref<1x64xf32, #tpu.memory_space<vmem>>, %arg11: memref<16x64xbf16, #tpu.memory_space<vmem>>, %arg12: memref<1x64xf32, #tpu.memory_space<vmem>>, %arg13: memref<128x64xbf16, #tpu.memory_space<vmem>>, %arg14: memref<1x64xf32, #tpu.memory_space<vmem>>, %arg15: memref<128x64xbf16, #tpu.memory_space<vmem>>, %arg16: memref<1x64xf32, #tpu.memory_space<vmem>>, %arg17: memref<128x64xbf16, #tpu.memory_space<vmem>>, %arg18: memref<1x64xf32, #tpu.memory_space<vmem>>, %arg19: memref<128x64xbf16, #tpu.memory_space<vmem>>, %arg20: memref<1x64xf32, #tpu.memory_space<vmem>>, %arg21: memref<128x512xbf16, #tpu.memory_space<vmem>>, %arg22: memref<1x512xf32, #tpu.memory_space<vmem>>, %arg23: memref<1x512xf32, #tpu.memory_space<vmem>>, %arg24: memref<512x64xbf16, #tpu.memory_space<vmem>>, %arg25: memref<1x64xf32, #tpu.memory_space<vmem>>, %arg26: memref<64x16xbf16, #tpu.memory_space<vmem>>, %arg27: memref<1x16xf32, #tpu.memory_space<vmem>>, %arg28: memref<16x16xbf16, #tpu.memory_space<vmem>>, %arg29: memref<1x16xf32, #tpu.memory_space<vmem>>, %arg30: memref<2x32xf32, #tpu.memory_space<vmem>>) attributes {dimension_semantics = [#tpu.dimension_semantics<arbitrary>], iteration_bounds = array<i64: 1>, scalar_prefetch = 0 : i64, scratch_operands = 0 : i64, tpu.core_type = #tpu.core_type<tc>, window_params = [{pipeline_mode = #tpu.pipeline_mode<synchronous>, transform_indices = @transform_0, window_bounds = array<i64: 16, 8>}, {pipeline_mode = #tpu.pipeline_mode<synchronous>, transform_indices = @transform_1, window_bounds = array<i64: 16, 8>}, {pipeline_mode = #tpu.pipeline_mode<synchronous>, transform_indices = @transform_2, window_bounds = array<i64: 32, 1>}, {pipeline_mode = #tpu.pipeline_mode<synchronous>, transform_indices = @transform_3, window_bounds = array<i64: 32, 1>}, {pipeline_mode = #tpu.pipeline_mode<synchronous>, transform_indices = @transform_4, window_bounds = array<i64: 32, 1>}, {pipeline_mode = #tpu.pipeline_mode<synchronous>, transform_indices = @transform_5, window_bounds = array<i64: 32, 1>}, {pipeline_mode = #tpu.pipeline_mode<synchronous>, transform_indices = @transform_6, window_bounds = array<i64: 32, 1>}, {pipeline_mode = #tpu.pipeline_mode<synchronous>, transform_indices = @transform_7, window_bounds = array<i64: 32, 1>}, {pipeline_mode = #tpu.pipeline_mode<synchronous>, transform_indices = @transform_8, window_bounds = array<i64: 16, 64>}, {pipeline_mode = #tpu.pipeline_mode<synchronous>, transform_indices = @transform_9, window_bounds = array<i64: 1, 64>}, {pipeline_mode = #tpu.pipeline_mode<synchronous>, transform_indices = @transform_10, window_bounds = array<i64: 16, 64>}, {pipeline_mode = #tpu.pipeline_mode<synchronous>, transform_indices = @transform_11, window_bounds = array<i64: 1, 64>}, {pipeline_mode = #tpu.pipeline_mode<synchronous>, transform_indices = @transform_12, window_bounds = array<i64: 128, 64>}, {pipeline_mode = #tpu.pipeline_mode<synchronous>, transform_indices = @transform_13, window_bounds = array<i64: 1, 64>}, {pipeline_mode = #tpu.pipeline_mode<synchronous>, transform_indices = @transform_14, window_bounds = array<i64: 128, 64>}, {pipeline_mode = #tpu.pipeline_mode<synchronous>, transform_indices = @transform_15, window_bounds = array<i64: 1, 64>}, {pipeline_mode = #tpu.pipeline_mode<synchronous>, transform_indices = @transform_16, window_bounds = array<i64: 128, 64>}, {pipeline_mode = #tpu.pipeline_mode<synchronous>, transform_indices = @transform_17, window_bounds = array<i64: 1, 64>}, {pipeline_mode = #tpu.pipeline_mode<synchronous>, transform_indices = @transform_18, window_bounds = array<i64: 128, 64>}, {pipeline_mode = #tpu.pipeline_mode<synchronous>, transform_indices = @transform_19, window_bounds = array<i64: 1, 64>}, {pipeline_mode = #tpu.pipeline_mode<synchronous>, transform_indices = @transform_20, window_bounds = array<i64: 128, 512>}, {pipeline_mode = #tpu.pipeline_mode<synchronous>, transform_indices = @transform_21, window_bounds = array<i64: 1, 512>}, {pipeline_mode = #tpu.pipeline_mode<synchronous>, transform_indices = @transform_22, window_bounds = array<i64: 1, 512>}, {pipeline_mode = #tpu.pipeline_mode<synchronous>, transform_indices = @transform_23, window_bounds = array<i64: 512, 64>}, {pipeline_mode = #tpu.pipeline_mode<synchronous>, transform_indices = @transform_24, window_bounds = array<i64: 1, 64>}, {pipeline_mode = #tpu.pipeline_mode<synchronous>, transform_indices = @transform_25, window_bounds = array<i64: 64, 16>}, {pipeline_mode = #tpu.pipeline_mode<synchronous>, transform_indices = @transform_26, window_bounds = array<i64: 1, 16>}, {pipeline_mode = #tpu.pipeline_mode<synchronous>, transform_indices = @transform_27, window_bounds = array<i64: 16, 16>}, {pipeline_mode = #tpu.pipeline_mode<synchronous>, transform_indices = @transform_28, window_bounds = array<i64: 1, 16>}, {pipeline_mode = #tpu.pipeline_mode<synchronous>, transform_indices = @transform_29, window_bounds = array<i64: 2, 32>}]} {
    %c0 = arith.constant 0 : index
    %c0_0 = arith.constant 0 : index
    %0 = vector.load %arg4[%c0, %c0_0] : memref<32x1xi32, #tpu.memory_space<vmem>>, vector<32x1xi32>
    %1 = tpu.iota {dimensions = array<i32: 1>} : vector<32x16xi32>
    %2 = vector.broadcast %0 : vector<32x1xi32> to vector<32x16xi32>
    %3 = arith.cmpi eq, %1, %2 : vector<32x16xi32>
    %4 = arith.extui %3 : vector<32x16xi1> to vector<32x16xi32>
    %5 = arith.sitofp %4 : vector<32x16xi32> to vector<32x16xf32>
    %6 = arith.truncf %5 : vector<32x16xf32> to vector<32x16xbf16>
    %c0_1 = arith.constant 0 : index
    %c0_2 = arith.constant 0 : index
    %7 = vector.load %arg5[%c0_1, %c0_2] : memref<32x1xi32, #tpu.memory_space<vmem>>, vector<32x1xi32>
    %8 = tpu.iota {dimensions = array<i32: 1>} : vector<32x16xi32>
    %9 = vector.broadcast %7 : vector<32x1xi32> to vector<32x16xi32>
    %10 = arith.cmpi eq, %8, %9 : vector<32x16xi32>
    %11 = arith.extui %10 : vector<32x16xi1> to vector<32x16xi32>
    %12 = arith.sitofp %11 : vector<32x16xi32> to vector<32x16xf32>
    %13 = arith.truncf %12 : vector<32x16xf32> to vector<32x16xbf16>
    %c0_3 = arith.constant 0 : index
    %c0_4 = arith.constant 0 : index
    %14 = vector.load %arg6[%c0_3, %c0_4] : memref<32x1xi32, #tpu.memory_space<vmem>>, vector<32x1xi32>
    %15 = tpu.iota {dimensions = array<i32: 1>} : vector<32x16xi32>
    %16 = vector.broadcast %14 : vector<32x1xi32> to vector<32x16xi32>
    %17 = arith.cmpi eq, %15, %16 : vector<32x16xi32>
    %18 = arith.extui %17 : vector<32x16xi1> to vector<32x16xi32>
    %19 = arith.sitofp %18 : vector<32x16xi32> to vector<32x16xf32>
    %20 = arith.truncf %19 : vector<32x16xf32> to vector<32x16xbf16>
    %c0_5 = arith.constant 0 : index
    %c0_6 = arith.constant 0 : index
    %21 = vector.load %arg7[%c0_5, %c0_6] : memref<32x1xi32, #tpu.memory_space<vmem>>, vector<32x1xi32>
    %22 = tpu.iota {dimensions = array<i32: 1>} : vector<32x16xi32>
    %23 = vector.broadcast %21 : vector<32x1xi32> to vector<32x16xi32>
    %24 = arith.cmpi eq, %22, %23 : vector<32x16xi32>
    %25 = arith.extui %24 : vector<32x16xi1> to vector<32x16xi32>
    %26 = arith.sitofp %25 : vector<32x16xi32> to vector<32x16xf32>
    %27 = arith.truncf %26 : vector<32x16xf32> to vector<32x16xbf16>
    %cst = arith.constant dense<0.000000e+00> : vector<16x16xf32>
    %28 = tpu.matmul %13, %6, %cst {dimension_numbers = #tpu.dot_dimension_numbers<[0], [0], [1], [1], [0, 1, 1, 1], [], []>} : vector<32x16xbf16>, vector<32x16xbf16>, vector<16x16xf32> -> vector<16x16xf32>
    %cst_7 = arith.constant dense<0.000000e+00> : vector<16xf32>
    %29 = vector.multi_reduction <add>, %28, %cst_7 [1] : vector<16x16xf32> to vector<16xf32>
    %30 = vector.shape_cast %29 : vector<16xf32> to vector<16x1xf32>
    %cst_8 = arith.constant 1.000000e+00 : f32
    %31 = vector.broadcast %cst_8 : f32 to vector<16x1xf32>
    %32 = arith.maximumf %30, %31 : vector<16x1xf32>
    %33 = vector.broadcast %32 : vector<16x1xf32> to vector<16x16xf32>
    %34 = arith.divf %28, %33 : vector<16x16xf32>
    %35 = arith.truncf %34 : vector<16x16xf32> to vector<16x16xbf16>
    %cst_9 = arith.constant dense<0.000000e+00> : vector<16x16xf32>
    %36 = tpu.matmul %27, %20, %cst_9 {dimension_numbers = #tpu.dot_dimension_numbers<[0], [0], [1], [1], [0, 1, 1, 1], [], []>} : vector<32x16xbf16>, vector<32x16xbf16>, vector<16x16xf32> -> vector<16x16xf32>
    %cst_10 = arith.constant dense<0.000000e+00> : vector<16xf32>
    %37 = vector.multi_reduction <add>, %36, %cst_10 [1] : vector<16x16xf32> to vector<16xf32>
    %38 = vector.shape_cast %37 : vector<16xf32> to vector<16x1xf32>
    %cst_11 = arith.constant 1.000000e+00 : f32
    %39 = vector.broadcast %cst_11 : f32 to vector<16x1xf32>
    %40 = arith.maximumf %38, %39 : vector<16x1xf32>
    %41 = vector.broadcast %40 : vector<16x1xf32> to vector<16x16xf32>
    %42 = arith.divf %36, %41 : vector<16x16xf32>
    %43 = arith.truncf %42 : vector<16x16xf32> to vector<16x16xbf16>
    %c0_12 = arith.constant 0 : index
    %c0_13 = arith.constant 0 : index
    %44 = vector.load %arg1[%c0_12, %c0_13] : memref<16x8xf32, #tpu.memory_space<vmem>>, vector<16x8xf32>
    %45 = arith.truncf %44 : vector<16x8xf32> to vector<16x8xbf16>
    %c0_14 = arith.constant 0 : index
    %c0_15 = arith.constant 0 : index
    %46 = vector.load %arg2[%c0_14, %c0_15] : memref<16x8xf32, #tpu.memory_space<vmem>>, vector<16x8xf32>
    %47 = arith.truncf %46 : vector<16x8xf32> to vector<16x8xbf16>
    %cst_16 = arith.constant dense<0.000000e+00> : vector<16x8xf32>
    %48 = tpu.matmul %35, %45, %cst_16 {dimension_numbers = #tpu.dot_dimension_numbers<[1], [0], [0], [1], [0, 0, 1, 1], [], []>} : vector<16x16xbf16>, vector<16x8xbf16>, vector<16x8xf32> -> vector<16x8xf32>
    %49 = arith.truncf %48 : vector<16x8xf32> to vector<16x8xbf16>
    %50 = tpu.concatenate %49, %47 in 1 : vector<16x8xbf16>, vector<16x8xbf16> -> vector<16x16xbf16>
    %c0_17 = arith.constant 0 : index
    %c0_18 = arith.constant 0 : index
    %51 = vector.load %arg9[%c0_17, %c0_18] : memref<16x64xbf16, #tpu.memory_space<vmem>>, vector<16x64xbf16>
    %cst_19 = arith.constant dense<0.000000e+00> : vector<16x64xf32>
    %52 = tpu.matmul %50, %51, %cst_19 {dimension_numbers = #tpu.dot_dimension_numbers<[1], [0], [0], [1], [0, 0, 1, 1], [], []>} : vector<16x16xbf16>, vector<16x64xbf16>, vector<16x64xf32> -> vector<16x64xf32>
    %c0_20 = arith.constant 0 : index
    %c0_21 = arith.constant 0 : index
    %53 = vector.load %arg10[%c0_20, %c0_21] : memref<1x64xf32, #tpu.memory_space<vmem>>, vector<1x64xf32>
    %54 = vector.broadcast %53 : vector<1x64xf32> to vector<16x64xf32>
    %55 = arith.addf %52, %54 : vector<16x64xf32>
    %cst_22 = arith.constant 0.000000e+00 : f32
    %56 = vector.broadcast %cst_22 : f32 to vector<16x64xf32>
    %57 = arith.cmpf ogt, %55, %56 : vector<16x64xf32>
    %cst_23 = arith.constant 0.00999999977 : f32
    %58 = vector.broadcast %cst_23 : f32 to vector<16x64xf32>
    %59 = arith.mulf %58, %55 : vector<16x64xf32>
    %60 = arith.select %57, %55, %59 : vector<16x64xi1>, vector<16x64xf32>
    %cst_24 = arith.constant dense<0.000000e+00> : vector<16x8xf32>
    %61 = tpu.matmul %43, %47, %cst_24 {dimension_numbers = #tpu.dot_dimension_numbers<[1], [0], [0], [1], [0, 0, 1, 1], [], []>} : vector<16x16xbf16>, vector<16x8xbf16>, vector<16x8xf32> -> vector<16x8xf32>
    %62 = arith.truncf %61 : vector<16x8xf32> to vector<16x8xbf16>
    %63 = tpu.concatenate %62, %45 in 1 : vector<16x8xbf16>, vector<16x8xbf16> -> vector<16x16xbf16>
    %c0_25 = arith.constant 0 : index
    %c0_26 = arith.constant 0 : index
    %64 = vector.load %arg11[%c0_25, %c0_26] : memref<16x64xbf16, #tpu.memory_space<vmem>>, vector<16x64xbf16>
    %cst_27 = arith.constant dense<0.000000e+00> : vector<16x64xf32>
    %65 = tpu.matmul %63, %64, %cst_27 {dimension_numbers = #tpu.dot_dimension_numbers<[1], [0], [0], [1], [0, 0, 1, 1], [], []>} : vector<16x16xbf16>, vector<16x64xbf16>, vector<16x64xf32> -> vector<16x64xf32>
    %c0_28 = arith.constant 0 : index
    %c0_29 = arith.constant 0 : index
    %66 = vector.load %arg12[%c0_28, %c0_29] : memref<1x64xf32, #tpu.memory_space<vmem>>, vector<1x64xf32>
    %67 = vector.broadcast %66 : vector<1x64xf32> to vector<16x64xf32>
    %68 = arith.addf %65, %67 : vector<16x64xf32>
    %cst_30 = arith.constant 0.000000e+00 : f32
    %69 = vector.broadcast %cst_30 : f32 to vector<16x64xf32>
    %70 = arith.cmpf ogt, %68, %69 : vector<16x64xf32>
    %cst_31 = arith.constant 0.00999999977 : f32
    %71 = vector.broadcast %cst_31 : f32 to vector<16x64xf32>
    %72 = arith.mulf %71, %68 : vector<16x64xf32>
    %73 = arith.select %70, %68, %72 : vector<16x64xi1>, vector<16x64xf32>
    %74 = arith.truncf %73 : vector<16x64xf32> to vector<16x64xbf16>
    %75 = arith.truncf %60 : vector<16x64xf32> to vector<16x64xbf16>
    %cst_32 = arith.constant dense<0.000000e+00> : vector<16x64xf32>
    %76 = tpu.matmul %35, %74, %cst_32 {dimension_numbers = #tpu.dot_dimension_numbers<[1], [0], [0], [1], [0, 0, 1, 1], [], []>} : vector<16x16xbf16>, vector<16x64xbf16>, vector<16x64xf32> -> vector<16x64xf32>
    %77 = arith.truncf %76 : vector<16x64xf32> to vector<16x64xbf16>
    %78 = tpu.concatenate %77, %75 in 1 : vector<16x64xbf16>, vector<16x64xbf16> -> vector<16x128xbf16>
    %c0_33 = arith.constant 0 : index
    %c0_34 = arith.constant 0 : index
    %79 = vector.load %arg13[%c0_33, %c0_34] : memref<128x64xbf16, #tpu.memory_space<vmem>>, vector<128x64xbf16>
    %cst_35 = arith.constant dense<0.000000e+00> : vector<16x64xf32>
    %80 = tpu.matmul %78, %79, %cst_35 {dimension_numbers = #tpu.dot_dimension_numbers<[1], [0], [0], [1], [0, 0, 1, 1], [], []>} : vector<16x128xbf16>, vector<128x64xbf16>, vector<16x64xf32> -> vector<16x64xf32>
    %c0_36 = arith.constant 0 : index
    %c0_37 = arith.constant 0 : index
    %81 = vector.load %arg14[%c0_36, %c0_37] : memref<1x64xf32, #tpu.memory_space<vmem>>, vector<1x64xf32>
    %82 = vector.broadcast %81 : vector<1x64xf32> to vector<16x64xf32>
    %83 = arith.addf %80, %82 : vector<16x64xf32>
    %cst_38 = arith.constant 0.000000e+00 : f32
    %84 = vector.broadcast %cst_38 : f32 to vector<16x64xf32>
    %85 = arith.cmpf ogt, %83, %84 : vector<16x64xf32>
    %cst_39 = arith.constant 0.00999999977 : f32
    %86 = vector.broadcast %cst_39 : f32 to vector<16x64xf32>
    %87 = arith.mulf %86, %83 : vector<16x64xf32>
    %88 = arith.select %85, %83, %87 : vector<16x64xi1>, vector<16x64xf32>
    %cst_40 = arith.constant dense<0.000000e+00> : vector<16x64xf32>
    %89 = tpu.matmul %43, %75, %cst_40 {dimension_numbers = #tpu.dot_dimension_numbers<[1], [0], [0], [1], [0, 0, 1, 1], [], []>} : vector<16x16xbf16>, vector<16x64xbf16>, vector<16x64xf32> -> vector<16x64xf32>
    %90 = arith.truncf %89 : vector<16x64xf32> to vector<16x64xbf16>
    %91 = tpu.concatenate %90, %74 in 1 : vector<16x64xbf16>, vector<16x64xbf16> -> vector<16x128xbf16>
    %c0_41 = arith.constant 0 : index
    %c0_42 = arith.constant 0 : index
    %92 = vector.load %arg15[%c0_41, %c0_42] : memref<128x64xbf16, #tpu.memory_space<vmem>>, vector<128x64xbf16>
    %cst_43 = arith.constant dense<0.000000e+00> : vector<16x64xf32>
    %93 = tpu.matmul %91, %92, %cst_43 {dimension_numbers = #tpu.dot_dimension_numbers<[1], [0], [0], [1], [0, 0, 1, 1], [], []>} : vector<16x128xbf16>, vector<128x64xbf16>, vector<16x64xf32> -> vector<16x64xf32>
    %c0_44 = arith.constant 0 : index
    %c0_45 = arith.constant 0 : index
    %94 = vector.load %arg16[%c0_44, %c0_45] : memref<1x64xf32, #tpu.memory_space<vmem>>, vector<1x64xf32>
    %95 = vector.broadcast %94 : vector<1x64xf32> to vector<16x64xf32>
    %96 = arith.addf %93, %95 : vector<16x64xf32>
    %cst_46 = arith.constant 0.000000e+00 : f32
    %97 = vector.broadcast %cst_46 : f32 to vector<16x64xf32>
    %98 = arith.cmpf ogt, %96, %97 : vector<16x64xf32>
    %cst_47 = arith.constant 0.00999999977 : f32
    %99 = vector.broadcast %cst_47 : f32 to vector<16x64xf32>
    %100 = arith.mulf %99, %96 : vector<16x64xf32>
    %101 = arith.select %98, %96, %100 : vector<16x64xi1>, vector<16x64xf32>
    %102 = arith.truncf %101 : vector<16x64xf32> to vector<16x64xbf16>
    %103 = arith.truncf %88 : vector<16x64xf32> to vector<16x64xbf16>
    %cst_48 = arith.constant dense<0.000000e+00> : vector<16x64xf32>
    %104 = tpu.matmul %35, %102, %cst_48 {dimension_numbers = #tpu.dot_dimension_numbers<[1], [0], [0], [1], [0, 0, 1, 1], [], []>} : vector<16x16xbf16>, vector<16x64xbf16>, vector<16x64xf32> -> vector<16x64xf32>
    %105 = arith.truncf %104 : vector<16x64xf32> to vector<16x64xbf16>
    %106 = tpu.concatenate %105, %103 in 1 : vector<16x64xbf16>, vector<16x64xbf16> -> vector<16x128xbf16>
    %c0_49 = arith.constant 0 : index
    %c0_50 = arith.constant 0 : index
    %107 = vector.load %arg17[%c0_49, %c0_50] : memref<128x64xbf16, #tpu.memory_space<vmem>>, vector<128x64xbf16>
    %cst_51 = arith.constant dense<0.000000e+00> : vector<16x64xf32>
    %108 = tpu.matmul %106, %107, %cst_51 {dimension_numbers = #tpu.dot_dimension_numbers<[1], [0], [0], [1], [0, 0, 1, 1], [], []>} : vector<16x128xbf16>, vector<128x64xbf16>, vector<16x64xf32> -> vector<16x64xf32>
    %c0_52 = arith.constant 0 : index
    %c0_53 = arith.constant 0 : index
    %109 = vector.load %arg18[%c0_52, %c0_53] : memref<1x64xf32, #tpu.memory_space<vmem>>, vector<1x64xf32>
    %110 = vector.broadcast %109 : vector<1x64xf32> to vector<16x64xf32>
    %111 = arith.addf %108, %110 : vector<16x64xf32>
    %cst_54 = arith.constant 0.000000e+00 : f32
    %112 = vector.broadcast %cst_54 : f32 to vector<16x64xf32>
    %113 = arith.cmpf ogt, %111, %112 : vector<16x64xf32>
    %cst_55 = arith.constant 0.00999999977 : f32
    %114 = vector.broadcast %cst_55 : f32 to vector<16x64xf32>
    %115 = arith.mulf %114, %111 : vector<16x64xf32>
    %116 = arith.select %113, %111, %115 : vector<16x64xi1>, vector<16x64xf32>
    %cst_56 = arith.constant dense<0.000000e+00> : vector<16x64xf32>
    %117 = tpu.matmul %43, %103, %cst_56 {dimension_numbers = #tpu.dot_dimension_numbers<[1], [0], [0], [1], [0, 0, 1, 1], [], []>} : vector<16x16xbf16>, vector<16x64xbf16>, vector<16x64xf32> -> vector<16x64xf32>
    %118 = arith.truncf %117 : vector<16x64xf32> to vector<16x64xbf16>
    %119 = tpu.concatenate %118, %102 in 1 : vector<16x64xbf16>, vector<16x64xbf16> -> vector<16x128xbf16>
    %c0_57 = arith.constant 0 : index
    %c0_58 = arith.constant 0 : index
    %120 = vector.load %arg19[%c0_57, %c0_58] : memref<128x64xbf16, #tpu.memory_space<vmem>>, vector<128x64xbf16>
    %cst_59 = arith.constant dense<0.000000e+00> : vector<16x64xf32>
    %121 = tpu.matmul %119, %120, %cst_59 {dimension_numbers = #tpu.dot_dimension_numbers<[1], [0], [0], [1], [0, 0, 1, 1], [], []>} : vector<16x128xbf16>, vector<128x64xbf16>, vector<16x64xf32> -> vector<16x64xf32>
    %c0_60 = arith.constant 0 : index
    %c0_61 = arith.constant 0 : index
    %122 = vector.load %arg20[%c0_60, %c0_61] : memref<1x64xf32, #tpu.memory_space<vmem>>, vector<1x64xf32>
    %123 = vector.broadcast %122 : vector<1x64xf32> to vector<16x64xf32>
    %124 = arith.addf %121, %123 : vector<16x64xf32>
    %cst_62 = arith.constant 0.000000e+00 : f32
    %125 = vector.broadcast %cst_62 : f32 to vector<16x64xf32>
    %126 = arith.cmpf ogt, %124, %125 : vector<16x64xf32>
    %cst_63 = arith.constant 0.00999999977 : f32
    %127 = vector.broadcast %cst_63 : f32 to vector<16x64xf32>
    %128 = arith.mulf %127, %124 : vector<16x64xf32>
    %129 = arith.select %126, %124, %128 : vector<16x64xi1>, vector<16x64xf32>
    %130 = arith.addf %73, %101 : vector<16x64xf32>
    %131 = arith.addf %130, %129 : vector<16x64xf32>
    %132 = arith.truncf %131 : vector<16x64xf32> to vector<16x64xbf16>
    %133 = arith.addf %60, %88 : vector<16x64xf32>
    %134 = arith.addf %133, %116 : vector<16x64xf32>
    %135 = arith.truncf %134 : vector<16x64xf32> to vector<16x64xbf16>
    %cst_64 = arith.constant dense<0.000000e+00> : vector<32x64xf32>
    %136 = tpu.matmul %6, %132, %cst_64 {dimension_numbers = #tpu.dot_dimension_numbers<[1], [0], [0], [1], [0, 0, 1, 1], [], []>} : vector<32x16xbf16>, vector<16x64xbf16>, vector<32x64xf32> -> vector<32x64xf32>
    %cst_65 = arith.constant dense<0.000000e+00> : vector<32x64xf32>
    %137 = tpu.matmul %13, %135, %cst_65 {dimension_numbers = #tpu.dot_dimension_numbers<[1], [0], [0], [1], [0, 0, 1, 1], [], []>} : vector<32x16xbf16>, vector<16x64xbf16>, vector<32x64xf32> -> vector<32x64xf32>
    %138 = arith.truncf %136 : vector<32x64xf32> to vector<32x64xbf16>
    %139 = arith.truncf %137 : vector<32x64xf32> to vector<32x64xbf16>
    %140 = tpu.concatenate %138, %139 in 1 : vector<32x64xbf16>, vector<32x64xbf16> -> vector<32x128xbf16>
    %c0_66 = arith.constant 0 : index
    %c0_67 = arith.constant 0 : index
    %141 = vector.load %arg21[%c0_66, %c0_67] : memref<128x512xbf16, #tpu.memory_space<vmem>>, vector<128x512xbf16>
    %cst_68 = arith.constant dense<0.000000e+00> : vector<32x512xf32>
    %142 = tpu.matmul %140, %141, %cst_68 {dimension_numbers = #tpu.dot_dimension_numbers<[1], [0], [0], [1], [0, 0, 1, 1], [], []>} : vector<32x128xbf16>, vector<128x512xbf16>, vector<32x512xf32> -> vector<32x512xf32>
    %c0_69 = arith.constant 0 : index
    %c0_70 = arith.constant 0 : index
    %143 = vector.load %arg3[%c0_69, %c0_70] : memref<32x1xf32, #tpu.memory_space<vmem>>, vector<32x1xf32>
    %c0_71 = arith.constant 0 : index
    %c0_72 = arith.constant 0 : index
    %144 = vector.load %arg22[%c0_71, %c0_72] : memref<1x512xf32, #tpu.memory_space<vmem>>, vector<1x512xf32>
    %145 = vector.broadcast %143 : vector<32x1xf32> to vector<32x512xf32>
    %146 = vector.broadcast %144 : vector<1x512xf32> to vector<32x512xf32>
    %147 = arith.mulf %145, %146 : vector<32x512xf32>
    %148 = arith.addf %142, %147 : vector<32x512xf32>
    %c0_73 = arith.constant 0 : index
    %c0_74 = arith.constant 0 : index
    %149 = vector.load %arg23[%c0_73, %c0_74] : memref<1x512xf32, #tpu.memory_space<vmem>>, vector<1x512xf32>
    %150 = vector.broadcast %149 : vector<1x512xf32> to vector<32x512xf32>
    %151 = arith.addf %148, %150 : vector<32x512xf32>
    %cst_75 = arith.constant 0.000000e+00 : f32
    %152 = vector.broadcast %cst_75 : f32 to vector<32x512xf32>
    %153 = arith.maximumf %151, %152 : vector<32x512xf32>
    %154 = arith.truncf %153 : vector<32x512xf32> to vector<32x512xbf16>
    %c0_76 = arith.constant 0 : index
    %c0_77 = arith.constant 0 : index
    %155 = vector.load %arg24[%c0_76, %c0_77] : memref<512x64xbf16, #tpu.memory_space<vmem>>, vector<512x64xbf16>
    %cst_78 = arith.constant dense<0.000000e+00> : vector<32x64xf32>
    %156 = tpu.matmul %154, %155, %cst_78 {dimension_numbers = #tpu.dot_dimension_numbers<[1], [0], [0], [1], [0, 0, 1, 1], [], []>} : vector<32x512xbf16>, vector<512x64xbf16>, vector<32x64xf32> -> vector<32x64xf32>
    %c0_79 = arith.constant 0 : index
    %c0_80 = arith.constant 0 : index
    %157 = vector.load %arg25[%c0_79, %c0_80] : memref<1x64xf32, #tpu.memory_space<vmem>>, vector<1x64xf32>
    %158 = vector.broadcast %157 : vector<1x64xf32> to vector<32x64xf32>
    %159 = arith.addf %156, %158 : vector<32x64xf32>
    %cst_81 = arith.constant 0.000000e+00 : f32
    %160 = vector.broadcast %cst_81 : f32 to vector<32x64xf32>
    %161 = arith.maximumf %159, %160 : vector<32x64xf32>
    %162 = arith.truncf %161 : vector<32x64xf32> to vector<32x64xbf16>
    %c0_82 = arith.constant 0 : index
    %c0_83 = arith.constant 0 : index
    %163 = vector.load %arg26[%c0_82, %c0_83] : memref<64x16xbf16, #tpu.memory_space<vmem>>, vector<64x16xbf16>
    %cst_84 = arith.constant dense<0.000000e+00> : vector<32x16xf32>
    %164 = tpu.matmul %162, %163, %cst_84 {dimension_numbers = #tpu.dot_dimension_numbers<[1], [0], [0], [1], [0, 0, 1, 1], [], []>} : vector<32x64xbf16>, vector<64x16xbf16>, vector<32x16xf32> -> vector<32x16xf32>
    %c0_85 = arith.constant 0 : index
    %c0_86 = arith.constant 0 : index
    %165 = vector.load %arg27[%c0_85, %c0_86] : memref<1x16xf32, #tpu.memory_space<vmem>>, vector<1x16xf32>
    %166 = vector.broadcast %165 : vector<1x16xf32> to vector<32x16xf32>
    %167 = arith.addf %164, %166 : vector<32x16xf32>
    %168 = arith.truncf %167 : vector<32x16xf32> to vector<32x16xbf16>
    %c0_87 = arith.constant 0 : index
    %c0_88 = arith.constant 0 : index
    %169 = vector.load %arg28[%c0_87, %c0_88] : memref<16x16xbf16, #tpu.memory_space<vmem>>, vector<16x16xbf16>
    %cst_89 = arith.constant dense<0.000000e+00> : vector<32x16xf32>
    %170 = tpu.matmul %168, %169, %cst_89 {dimension_numbers = #tpu.dot_dimension_numbers<[1], [0], [0], [1], [0, 0, 1, 1], [], []>} : vector<32x16xbf16>, vector<16x16xbf16>, vector<32x16xf32> -> vector<32x16xf32>
    %c0_90 = arith.constant 0 : index
    %c0_91 = arith.constant 0 : index
    %171 = vector.load %arg29[%c0_90, %c0_91] : memref<1x16xf32, #tpu.memory_space<vmem>>, vector<1x16xf32>
    %172 = vector.broadcast %171 : vector<1x16xf32> to vector<32x16xf32>
    %173 = arith.addf %170, %172 : vector<32x16xf32>
    %174 = math.tanh %173 : vector<32x16xf32>
    %175 = arith.mulf %174, %167 : vector<32x16xf32>
    %176 = tpu.iota {dimensions = array<i32: 1>} : vector<32x2xi32>
    %c0_92 = arith.constant 0 : index
    %c0_93 = arith.constant 0 : index
    %177 = vector.load %arg8[%c0_92, %c0_93] : memref<32x1xi32, #tpu.memory_space<vmem>>, vector<32x1xi32>
    %178 = vector.broadcast %177 : vector<32x1xi32> to vector<32x2xi32>
    %179 = arith.cmpi eq, %176, %178 : vector<32x2xi32>
    %180 = arith.extui %179 : vector<32x2xi1> to vector<32x2xi32>
    %181 = arith.sitofp %180 : vector<32x2xi32> to vector<32x2xf32>
    %cst_94 = arith.constant dense<0.000000e+00> : vector<2x16xf32>
    %182 = tpu.matmul %181, %175, %cst_94 {dimension_numbers = #tpu.dot_dimension_numbers<[0], [0], [1], [1], [0, 1, 1, 1], [], []>} : vector<32x2xf32>, vector<32x16xf32>, vector<2x16xf32> -> vector<2x16xf32>
    %c0_95 = arith.constant 0 : index
    %c0_96 = arith.constant 0 : index
    %183 = vector.load %arg30[%c0_95, %c0_96] : memref<2x32xf32, #tpu.memory_space<vmem>>, vector<2x16xf32>
    tpu.vector_store %arg30[%c0_95, %c0_96], %182 {strides = array<i32>} : memref<2x32xf32, #tpu.memory_space<vmem>>, vector<2x16xf32>,
    %c0_97 = arith.constant 0 : index
    %c0_98 = arith.constant 0 : index
    %184 = vector.load %arg8[%c0_97, %c0_98] : memref<32x1xi32, #tpu.memory_space<vmem>>, vector<32x1xi32>
    %c0_i32 = arith.constant 0 : i32
    %185 = vector.broadcast %c0_i32 : i32 to vector<32x1xi32>
    %186 = arith.cmpi eq, %184, %185 : vector<32x1xi32>
    %cst_99 = arith.constant -3.000000e+38 : f32
    %187 = vector.shape_cast %186 : vector<32x1xi1> to vector<32x1xi1>
    %188 = vector.broadcast %187 : vector<32x1xi1> to vector<32x16xi1>
    %189 = vector.broadcast %cst_99 : f32 to vector<32x16xf32>
    %190 = arith.select %188, %167, %189 : vector<32x16xi1>, vector<32x16xf32>
    %cst_100 = arith.constant dense<0xFF800000> : vector<16xf32>
    %191 = vector.multi_reduction <maximumf>, %190, %cst_100 [0] : vector<32x16xf32> to vector<16xf32>
    %192 = vector.shape_cast %191 : vector<16xf32> to vector<1x16xf32>
    %193 = arith.extui %186 : vector<32x1xi1> to vector<32x1xi32>
    %194 = arith.sitofp %193 : vector<32x1xi32> to vector<32x1xf32>
    %195 = vector.shape_cast %194 : vector<32x1xf32> to vector<1x32x1xf32>
    %cst_101 = arith.constant dense<0xFF800000> : vector<1xf32>
    %196 = vector.multi_reduction <maximumf>, %195, %cst_101 [1, 2] : vector<1x32x1xf32> to vector<1xf32>
    %197 = vector.shape_cast %196 : vector<1xf32> to vector<1x1x1xf32>
    %198 = vector.extract %197[0, 0, 0] : f32 from vector<1x1x1xf32>
    %cst_102 = arith.constant 5.000000e-01 : f32
    %199 = arith.cmpf ogt, %198, %cst_102 : f32
    %cst_103 = arith.constant 0.000000e+00 : f32
    %200 = vector.broadcast %cst_103 : f32 to vector<1x16xf32>
    %201 = arith.select %199, %192, %200 : vector<1x16xf32>
    %c0_104 = arith.constant 0 : index
    %c16 = arith.constant 16 : index
    %202 = vector.load %arg30[%c0_104, %c16] : memref<2x32xf32, #tpu.memory_space<vmem>>, vector<1x16xf32>
    tpu.vector_store %arg30[%c0_104, %c16], %201 {strides = array<i32>} : memref<2x32xf32, #tpu.memory_space<vmem>>, vector<1x16xf32>,
    %c0_105 = arith.constant 0 : index
    %c0_106 = arith.constant 0 : index
    %203 = vector.load %arg8[%c0_105, %c0_106] : memref<32x1xi32, #tpu.memory_space<vmem>>, vector<32x1xi32>
    %c1_i32 = arith.constant 1 : i32
    %204 = vector.broadcast %c1_i32 : i32 to vector<32x1xi32>
    %205 = arith.cmpi eq, %203, %204 : vector<32x1xi32>
    %cst_107 = arith.constant -3.000000e+38 : f32
    %206 = vector.shape_cast %205 : vector<32x1xi1> to vector<32x1xi1>
    %207 = vector.broadcast %206 : vector<32x1xi1> to vector<32x16xi1>
    %208 = vector.broadcast %cst_107 : f32 to vector<32x16xf32>
    %209 = arith.select %207, %167, %208 : vector<32x16xi1>, vector<32x16xf32>
    %cst_108 = arith.constant dense<0xFF800000> : vector<16xf32>
    %210 = vector.multi_reduction <maximumf>, %209, %cst_108 [0] : vector<32x16xf32> to vector<16xf32>
    %211 = vector.shape_cast %210 : vector<16xf32> to vector<1x16xf32>
    %212 = arith.extui %205 : vector<32x1xi1> to vector<32x1xi32>
    %213 = arith.sitofp %212 : vector<32x1xi32> to vector<32x1xf32>
    %214 = vector.shape_cast %213 : vector<32x1xf32> to vector<1x32x1xf32>
    %cst_109 = arith.constant dense<0xFF800000> : vector<1xf32>
    %215 = vector.multi_reduction <maximumf>, %214, %cst_109 [1, 2] : vector<1x32x1xf32> to vector<1xf32>
    %216 = vector.shape_cast %215 : vector<1xf32> to vector<1x1x1xf32>
    %217 = vector.extract %216[0, 0, 0] : f32 from vector<1x1x1xf32>
    %cst_110 = arith.constant 5.000000e-01 : f32
    %218 = arith.cmpf ogt, %217, %cst_110 : f32
    %cst_111 = arith.constant 0.000000e+00 : f32
    %219 = vector.broadcast %cst_111 : f32 to vector<1x16xf32>
    %220 = arith.select %218, %211, %219 : vector<1x16xf32>
    %c1 = arith.constant 1 : index
    %c16_112 = arith.constant 16 : index
    %221 = vector.load %arg30[%c1, %c16_112] : memref<2x32xf32, #tpu.memory_space<vmem>>, vector<1x16xf32>
    tpu.vector_store %arg30[%c1, %c16_112], %220 {strides = array<i32>} : memref<2x32xf32, #tpu.memory_space<vmem>>, vector<1x16xf32>,
    return
  }
  func.func @transform_0(%arg0: i32) -> (i32, i32) {
    %c0_i32 = arith.constant 0 : i32
    %c0_i32_0 = arith.constant 0 : i32
    %c0_i32_1 = arith.constant 0 : i32
    return %c0_i32, %c0_i32_0 : i32, i32
  }
  func.func @transform_1(%arg0: i32) -> (i32, i32) {
    %c0_i32 = arith.constant 0 : i32
    %c0_i32_0 = arith.constant 0 : i32
    %c0_i32_1 = arith.constant 0 : i32
    return %c0_i32, %c0_i32_0 : i32, i32
  }
  func.func @transform_2(%arg0: i32) -> (i32, i32) {
    %c0_i32 = arith.constant 0 : i32
    %c0_i32_0 = arith.constant 0 : i32
    %c0_i32_1 = arith.constant 0 : i32
    return %c0_i32, %c0_i32_0 : i32, i32
  }
  func.func @transform_3(%arg0: i32) -> (i32, i32) {
    %c0_i32 = arith.constant 0 : i32
    %c0_i32_0 = arith.constant 0 : i32
    %c0_i32_1 = arith.constant 0 : i32
    return %c0_i32, %c0_i32_0 : i32, i32
  }
  func.func @transform_4(%arg0: i32) -> (i32, i32) {
    %c0_i32 = arith.constant 0 : i32
    %c0_i32_0 = arith.constant 0 : i32
    %c0_i32_1 = arith.constant 0 : i32
    return %c0_i32, %c0_i32_0 : i32, i32
  }
  func.func @transform_5(%arg0: i32) -> (i32, i32) {
    %c0_i32 = arith.constant 0 : i32
    %c0_i32_0 = arith.constant 0 : i32
    %c0_i32_1 = arith.constant 0 : i32
    return %c0_i32, %c0_i32_0 : i32, i32
  }
  func.func @transform_6(%arg0: i32) -> (i32, i32) {
    %c0_i32 = arith.constant 0 : i32
    %c0_i32_0 = arith.constant 0 : i32
    %c0_i32_1 = arith.constant 0 : i32
    return %c0_i32, %c0_i32_0 : i32, i32
  }
  func.func @transform_7(%arg0: i32) -> (i32, i32) {
    %c0_i32 = arith.constant 0 : i32
    %c0_i32_0 = arith.constant 0 : i32
    %c0_i32_1 = arith.constant 0 : i32
    return %c0_i32, %c0_i32_0 : i32, i32
  }
  func.func @transform_8(%arg0: i32) -> (i32, i32) {
    %c0_i32 = arith.constant 0 : i32
    %c0_i32_0 = arith.constant 0 : i32
    %c0_i32_1 = arith.constant 0 : i32
    return %c0_i32, %c0_i32_0 : i32, i32
  }
  func.func @transform_9(%arg0: i32) -> (i32, i32) {
    %c0_i32 = arith.constant 0 : i32
    %c0_i32_0 = arith.constant 0 : i32
    %c0_i32_1 = arith.constant 0 : i32
    return %c0_i32, %c0_i32_0 : i32, i32
  }
  func.func @transform_10(%arg0: i32) -> (i32, i32) {
    %c0_i32 = arith.constant 0 : i32
    %c0_i32_0 = arith.constant 0 : i32
    %c0_i32_1 = arith.constant 0 : i32
    return %c0_i32, %c0_i32_0 : i32, i32
  }
  func.func @transform_11(%arg0: i32) -> (i32, i32) {
    %c0_i32 = arith.constant 0 : i32
    %c0_i32_0 = arith.constant 0 : i32
    %c0_i32_1 = arith.constant 0 : i32
    return %c0_i32, %c0_i32_0 : i32, i32
  }
  func.func @transform_12(%arg0: i32) -> (i32, i32) {
    %c0_i32 = arith.constant 0 : i32
    %c0_i32_0 = arith.constant 0 : i32
    %c0_i32_1 = arith.constant 0 : i32
    return %c0_i32, %c0_i32_0 : i32, i32
  }
  func.func @transform_13(%arg0: i32) -> (i32, i32) {
    %c0_i32 = arith.constant 0 : i32
    %c0_i32_0 = arith.constant 0 : i32
    %c0_i32_1 = arith.constant 0 : i32
    return %c0_i32, %c0_i32_0 : i32, i32
  }
  func.func @transform_14(%arg0: i32) -> (i32, i32) {
    %c0_i32 = arith.constant 0 : i32
    %c0_i32_0 = arith.constant 0 : i32
    %c0_i32_1 = arith.constant 0 : i32
    return %c0_i32, %c0_i32_0 : i32, i32
  }
  func.func @transform_15(%arg0: i32) -> (i32, i32) {
    %c0_i32 = arith.constant 0 : i32
    %c0_i32_0 = arith.constant 0 : i32
    %c0_i32_1 = arith.constant 0 : i32
    return %c0_i32, %c0_i32_0 : i32, i32
  }
  func.func @transform_16(%arg0: i32) -> (i32, i32) {
    %c0_i32 = arith.constant 0 : i32
    %c0_i32_0 = arith.constant 0 : i32
    %c0_i32_1 = arith.constant 0 : i32
    return %c0_i32, %c0_i32_0 : i32, i32
  }
  func.func @transform_17(%arg0: i32) -> (i32, i32) {
    %c0_i32 = arith.constant 0 : i32
    %c0_i32_0 = arith.constant 0 : i32
    %c0_i32_1 = arith.constant 0 : i32
    return %c0_i32, %c0_i32_0 : i32, i32
  }
  func.func @transform_18(%arg0: i32) -> (i32, i32) {
    %c0_i32 = arith.constant 0 : i32
    %c0_i32_0 = arith.constant 0 : i32
    %c0_i32_1 = arith.constant 0 : i32
    return %c0_i32, %c0_i32_0 : i32, i32
  }
  func.func @transform_19(%arg0: i32) -> (i32, i32) {
    %c0_i32 = arith.constant 0 : i32
    %c0_i32_0 = arith.constant 0 : i32
    %c0_i32_1 = arith.constant 0 : i32
    return %c0_i32, %c0_i32_0 : i32, i32
  }
  func.func @transform_20(%arg0: i32) -> (i32, i32) {
    %c0_i32 = arith.constant 0 : i32
    %c0_i32_0 = arith.constant 0 : i32
    %c0_i32_1 = arith.constant 0 : i32
    return %c0_i32, %c0_i32_0 : i32, i32
  }
  func.func @transform_21(%arg0: i32) -> (i32, i32) {
    %c0_i32 = arith.constant 0 : i32
    %c0_i32_0 = arith.constant 0 : i32
    %c0_i32_1 = arith.constant 0 : i32
    return %c0_i32, %c0_i32_0 : i32, i32
  }
  func.func @transform_22(%arg0: i32) -> (i32, i32) {
    %c0_i32 = arith.constant 0 : i32
    %c0_i32_0 = arith.constant 0 : i32
    %c0_i32_1 = arith.constant 0 : i32
    return %c0_i32, %c0_i32_0 : i32, i32
  }
  func.func @transform_23(%arg0: i32) -> (i32, i32) {
    %c0_i32 = arith.constant 0 : i32
    %c0_i32_0 = arith.constant 0 : i32
    %c0_i32_1 = arith.constant 0 : i32
    return %c0_i32, %c0_i32_0 : i32, i32
  }
  func.func @transform_24(%arg0: i32) -> (i32, i32) {
    %c0_i32 = arith.constant 0 : i32
    %c0_i32_0 = arith.constant 0 : i32
    %c0_i32_1 = arith.constant 0 : i32
    return %c0_i32, %c0_i32_0 : i32, i32
  }
  func.func @transform_25(%arg0: i32) -> (i32, i32) {
    %c0_i32 = arith.constant 0 : i32
    %c0_i32_0 = arith.constant 0 : i32
    %c0_i32_1 = arith.constant 0 : i32
    return %c0_i32, %c0_i32_0 : i32, i32
  }
  func.func @transform_26(%arg0: i32) -> (i32, i32) {
    %c0_i32 = arith.constant 0 : i32
    %c0_i32_0 = arith.constant 0 : i32
    %c0_i32_1 = arith.constant 0 : i32
    return %c0_i32, %c0_i32_0 : i32, i32
  }
  func.func @transform_27(%arg0: i32) -> (i32, i32) {
    %c0_i32 = arith.constant 0 : i32
    %c0_i32_0 = arith.constant 0 : i32
    %c0_i32_1 = arith.constant 0 : i32
    return %c0_i32, %c0_i32_0 : i32, i32
  }
  func.func @transform_28(%arg0: i32) -> (i32, i32) {
    %c0_i32 = arith.constant 0 : i32
    %c0_i32_0 = arith.constant 0 : i32
    %c0_i32_1 = arith.constant 0 : i32
    return %c0_i32, %c0_i32_0 : i32, i32
  }
  func.func @transform_29(%arg0: i32) -> (i32, i32) {
    %c0_i32 = arith.constant 0 : i32
    %c0_i32_0 = arith.constant 0 : i32
    %c0_i32_1 = arith.constant 0 : i32
    return %c0_i32, %c0_i32_0 : i32, i32
  }
}

</mosaic_0001>

<bundles_post_ra>
// kernel: tpu_custom_call.1
= control target key start
LH: loop header
LB: loop body
LE: loop exit
PB: predicated region body
PF: predicated region fallthrough
CT: control target
= control target key end

     0   :  { %s3430_s6 = smov 1   ;;  %s3431_s10 = smov 2   ;;  %s4145_s0 = inlined_call_operand.smem [shape: u32[30], index: -1, kind: input, shape index: {}] }
   0x1   :  { %s3476_s5 = sld [smem:[%s4145_s0]]   ;;  %s3432_s14 = smov 3  }
   0x2   :  { %s3481_s9 = sld [smem:[%s4145_s0 + %s3430_s6]]   ;;  %s3433_s18 = smov 4  }
   0x3   :  { %s3486_s13 = sld [smem:[%s4145_s0 + %s3431_s10]]   ;;  %s3434_s22 = smov 5  }
   0x4   :  { %s3491_s17 = sld [smem:[%s4145_s0 + %s3432_s14]]   ;;  %s3435_s26 = smov 6  }
   0x5   :  { %s3496_s21 = sld [smem:[%s4145_s0 + %s3433_s18]]   ;;  %s3436_s30 = smov 7  }
   0x6   :  { %s3501_s25 = sld [smem:[%s4145_s0 + %s3434_s22]]   ;;  %s3437_s4 = smov 8  }
   0x7   :  { %s3506_s29 = sld [smem:[%s4145_s0 + %s3435_s26]]   ;;  %s3438_s10 = smov 9  }
   0x8   :  { %s3511_s3 = sld [smem:[%s4145_s0 + %s3436_s30]]   ;;  %s3439_s15 = smov 10  }
   0x9   :  { %4153 = sst [smem:[#allocation5_spill]] %s3486_s13  ;;  %s3440_s20 = smov 11  }
   0xa   :  { %s3516_s8 = sld [smem:[%s4145_s0 + %s3437_s4]]   ;;  %s3441_s26 = smov 12  }
   0xb   :  { %s3521_s14 = sld [smem:[%s4145_s0 + %s3438_s10]]   ;;  %s3442_s1 = smov 13  }
   0xc   :  { %s3526_s19 = sld [smem:[%s4145_s0 + %s3439_s15]]   ;;  %s3443_s7 = smov 14  }
   0xd   :  { %s3531_s24 = sld [smem:[%s4145_s0 + %s3440_s20]]   ;;  %s3444_s15 = smov 15  }
   0xe   :  { %4154 = sst [smem:[#allocation6_spill]] %s3511_s3  ;;  %s3445_s22 = smov 16  }
   0xf   :  { %s3536_s30 = sld [smem:[%s4145_s0 + %s3441_s26]]   ;;  %s3446_s28 = smov 17  }
  0x10   :  { %s3541_s6 = sld [smem:[%s4145_s0 + %s3442_s1]]  }
  0x11   :  { %s3546_s12 = sld [smem:[%s4145_s0 + %s3443_s7]]   ;;  %s3447_s7 = smov 18  }
  0x12   :  { %s3551_s20 = sld [smem:[%s4145_s0 + %s3444_s15]]   ;;  %s3448_s15 = smov 19  }
  0x13   :  { %s3556_s27 = sld [smem:[%s4145_s0 + %s3445_s22]]   ;;  %s3449_s22 = smov 20  }
  0x14   :  { %s3561_s4 = sld [smem:[%s4145_s0 + %s3446_s28]]   ;;  %s3450_s28 = smov 21  }
  0x15   :  { %s3566_s3 = sld [smem:[%s4145_s0 + %s3447_s7]]   ;;  %s3451_s7 = smov 22  }
  0x16   :  { %s3571_s13 = sld [smem:[%s4145_s0 + %s3448_s15]]   ;;  %s3452_s15 = smov 23  }
  0x19   :  { %4155 = sst [smem:[#allocation7_spill]] %s3556_s27 }
  0x1a   :  { %4156 = sst [smem:[#allocation8_spill]] %s3561_s4 }
  0x1b   :  { %4157 = sst [smem:[#allocation9_spill]] %s3566_s3 }
  0x1c   :  { %4158 = sst [smem:[#allocation10_spill]] %s3571_s13 }
  0x1d   :  { %s3576_s27 = sld [smem:[%s4145_s0 + %s3449_s22]]   ;;  %s3453_s22 = smov 24  }
  0x1e   :  { %s3581_s4 = sld [smem:[%s4145_s0 + %s3450_s28]]   ;;  %s3454_s28 = smov 25  }
  0x1f   :  { %s3586_s3 = sld [smem:[%s4145_s0 + %s3451_s7]]   ;;  %s3455_s7 = smov 26  }
  0x20   :  { %s3591_s13 = sld [smem:[%s4145_s0 + %s3452_s15]]   ;;  %s3456_s15 = smov 27  }
  0x23   :  { %4159 = sst [smem:[#allocation11_spill]] %s3576_s27 }
  0x24   :  { %4160 = sst [smem:[#allocation12_spill]] %s3581_s4 }
  0x25   :  { %4161 = sst [smem:[#allocation13_spill]] %s3586_s3 }
  0x26   :  { %4162 = sst [smem:[#allocation14_spill]] %s3591_s13 }
  0x27   :  { %s3596_s27 = sld [smem:[%s4145_s0 + %s3453_s22]]   ;;  %s3457_s22 = smov 28  }
  0x28   :  { %s3601_s4 = sld [smem:[%s4145_s0 + %s3454_s28]]   ;;  %s3458_s28 = smov 29  }
  0x29   :  { %s3606_s3 = sld [smem:[%s4145_s0 + %s3455_s7]]  }
  0x2a   :  { %s3611_s13 = sld [smem:[%s4145_s0 + %s3456_s15]]  }
  0x2d   :  { %4163 = sst [smem:[#allocation15_spill]] %s3596_s27 }
  0x2e   :  { %4164 = sst [smem:[#allocation16_spill]] %s3601_s4 }
  0x2f   :  { %s3616_s27 = sld [smem:[%s4145_s0 + %s3457_s22]]  }
  0x30   :  { %s3621_s4 = sld [smem:[%s4145_s0 + %s3458_s28]]  }
  0x31   :  { %v158_v0 = vld [vmem:[%s3496_s21 + $0x10] sm:$0xff]  ;;  %v156_v1 = vld [vmem:[%s3496_s21] sm:$0xff]  ;;  %v3459_v2 = vmov 0   ;;  %v159_v3 = vld [vmem:[%s3496_s21 + $0x18] sm:$0xff]  ;;  %v3460_v5 = vmov 0.0   ;;  %vm3461_vm0 = vmmov 0  }
  0x32   :  { %3270 = vset.pattern.permute.xlu1 %v3459_v2  ;;  %3269 = vset.pattern.permute.xlu0 %v3459_v2  ;;  %v157_v4 = vld [vmem:[%s3496_s21 + $0x8] sm:$0xff]  ;;  %v216_v7 = vld [vmem:[%s3506_s29] sm:$0xff]  ;;  %v219_v8 = vld [vmem:[%s3506_s29 + $0x18] sm:$0xff] }
  0x33   :  { %167 = vperm.xlu1 %3270, %v158_v0   ;;  %161 = vperm.xlu0 %3269, %v156_v1   ;;  %v217_v6 = vld [vmem:[%s3506_s29 + $0x8] sm:$0xff]  ;;  %v218_v9 = vld [vmem:[%s3506_s29 + $0x10] sm:$0xff]  ;;  %v124_v11 = vld [vmem:[%s3491_s17] sm:$0xff] }
  0x34   :  { %3036 = vmatprep.subr.bf16.mxu0 %v3460_v5  ;;  %3044 = vmatprep.subr.bf16.mxu1 %v3460_v5  ;;  %v125_v10 = vld [vmem:[%s3491_s17 + $0x8] sm:$0xff]  ;;  %v127_v12 = vld [vmem:[%s3491_s17 + $0x18] sm:$0xff]  ;;  %v126_v13 = vld [vmem:[%s3491_s17 + $0x10] sm:$0xff] }
  0x35   :  { %v187_v14 = vld [vmem:[%s3501_s25 + $0x8] sm:$0xff]  ;;  %v186_v15 = vld [vmem:[%s3501_s25] sm:$0xff]  ;;  %v189_v16 = vld [vmem:[%s3501_s25 + $0x18] sm:$0xff]  ;;  %3040 = vmatprep.mubr.msk.bf16.mxu0 %vm3461_vm0, %v3460_v5  ;;  %3048 = vmatprep.mubr.msk.bf16.mxu1 %vm3461_vm0, %v3460_v5 }
  0x36   :  { %v188_v17 = vld [vmem:[%s3501_s25 + $0x10] sm:$0xff] }
  0x37   :  { %170 = vperm.xlu1 %3270, %v159_v3   ;;  %164 = vperm.xlu0 %3269, %v157_v4  }
  0x3b   :  { %224 = vperm.xlu1 %3270, %v217_v6   ;;  %221 = vperm.xlu0 %3269, %v216_v7  }
  0x3f   :  { %230 = vperm.xlu1 %3270, %v219_v8   ;;  %227 = vperm.xlu0 %3269, %v218_v9  }
  0x43   :  { %134 = vperm.xlu1 %3270, %v125_v10   ;;  %131 = vperm.xlu0 %3269, %v124_v11  }
  0x47   :  { %140 = vperm.xlu1 %3270, %v127_v12   ;;  %137 = vperm.xlu0 %3269, %v126_v13  }
  0x4b   :  { %194 = vperm.xlu1 %3270, %v187_v14   ;;  %191 = vperm.xlu0 %3269, %v186_v15  }
  0x4f   :  { %200 = vperm.xlu1 %3270, %v189_v16   ;;  %197 = vperm.xlu0 %3269, %v188_v17  }
  0x50   :  { %64 = vsyncpa [#allocation3], 0  ;;  %v128_v18 = vlaneseq  ;;  %v3462_v45 = vmov 1.0|1.0   ;;  %v394_v7 = vld [vmem:[%s3476_s5] sm:$0xff]  ;;  %v395_v8 = vld [vmem:[%s3476_s5 + $0x8] sm:$0xff] }
  0x51   :  { %v396_v9 = vpack.c.bf16 %v395_v8, %v394_v7  ;;  %v397_v10 = vld [vmem:[%s3481_s9] sm:$0xff]  ;;  %v398_v11 = vld [vmem:[%s3481_s9 + $0x8] sm:$0xff]  ;;  %s3463_s0 = smov 8   ;;  %s3464_s5 = smov 64  }
  0x52   :  { %v3648_v19 = vand.u32 127, %v128_v18  ;;  %v399_v12 = vpack.c.bf16 %v398_v11, %v397_v10  ;;  %s4165_s9 = sld [smem:[#allocation9_spill]]  ;;  %s4166_s17 = sld [smem:[#allocation7_spill]] }
  0x53   :  { %s4167_s21 = sld [smem:[#allocation10_spill]]  ;;  %s4168_s25 = sld [smem:[#allocation8_spill]] }
  0x54   :  { %s4169_s29 = sld [smem:[#allocation11_spill]]  ;;  %s3465_s10 = smov 16  }
  0xb2   :  { %v168_v20 = vpop.permute.xlu1 %167  ;;  %v162_v21 = vpop.permute.xlu0 %161 }
  0xb3   :  { %vm172_vm1 = vcmp.eq.s32.totalorder %v3648_v19, %v162_v21  ;;  %vm174_vm4 = vcmp.eq.s32.totalorder %v3648_v19, %v168_v20 }
  0xb4   :  { %v2739_v24 = vsel %vm172_vm1, 1.0, %v3460_v5  ;;  %v2741_v30 = vsel %vm174_vm4, 1.0, %v3460_v5 }
  0xb6   :  { %v171_v22 = vpop.permute.xlu1 %170  ;;  %v165_v23 = vpop.permute.xlu0 %164 }
  0xb7   :  { %vm175_vm2 = vcmp.eq.s32.totalorder %v3648_v19, %v171_v22  ;;  %vm173_vm3 = vcmp.eq.s32.totalorder %v3648_v19, %v165_v23 }
  0xb8   :  { %v2740_v25 = vsel %vm173_vm3, 1.0, %v3460_v5  ;;  %v2742_v27 = vsel %vm175_vm2, 1.0, %v3460_v5 }
  0xb9   :  { %v3656_v26 = vpack.c.bf16 %v2740_v25, %v2739_v24  ;;  %v3665_v33 = vpack.c.bf16 %v2742_v27, %v2741_v30 }
  0xba   :  { %v225_v28 = vpop.permute.xlu1 %224  ;;  %v222_v29 = vpop.permute.xlu0 %221 }
  0xbb   :  { %vm233_vm5 = vcmp.eq.s32.totalorder %v3648_v19, %v225_v28  ;;  %vm232_vm6 = vcmp.eq.s32.totalorder %v3648_v19, %v222_v29  ;;  %246 = vxpose.xlu0.c.b16.start [1/2] (short) (narrow) %v3656_v26, 16 }
  0xbc   :  { %v2748_v31 = vsel %vm233_vm5, 1.0, %v3460_v5  ;;  %v2747_v32 = vsel %vm232_vm6, 1.0, %v3460_v5  ;;  %vm262_vm6 = vcmask 261120  }
  0xbd   :  { %v244_v34 = vpack.c.bf16 %v2748_v31, %v2747_v32 }
  0xbe   :  { %v231_v35 = vpop.permute.xlu1 %230  ;;  %v228_v36 = vpop.permute.xlu0 %227 }
  0xbf   :  { %vm235_vm7 = vcmp.eq.s32.totalorder %v3648_v19, %v231_v35  ;;  %vm234_vm8 = vcmp.eq.s32.totalorder %v3648_v19, %v228_v36  ;;  %321 = vxpose.xlu1.c.b16.start [1/2] (short) (narrow) %v244_v34, 16  ;;  %247 = vxpose.xlu0.c.b16.end [2/2] (short) (narrow) %v3665_v33, 16  ;;  %v3271_v35 = vld [vmem:[%s3516_s8] sm:$0xff]   ;;  %s4170_s8 = sld [smem:[#allocation5_spill]] }
  0xc0   :  { %v2750_v37 = vsel %vm235_vm7, 1.0, %v3460_v5  ;;  %v2749_v38 = vsel %vm234_vm8, 1.0, %v3460_v5  ;;  %vm307_vm7 = vcmask 130048   ;;  %vm448_vm8 = vcmask 64512  }
  0xc1   :  { %v245_v39 = vpack.c.bf16 %v2750_v37, %v2749_v38 }
  0xc2   :  { %v135_v40 = vpop.permute.xlu1 %134  ;;  %v132_v41 = vpop.permute.xlu0 %131 }
  0xc3   :  { %vm143_vm9 = vcmp.eq.s32.totalorder %v3648_v19, %v135_v40  ;;  %vm142_vm10 = vcmp.eq.s32.totalorder %v3648_v19, %v132_v41  ;;  %322 = vxpose.xlu1.c.b16.end [2/2] (short) (narrow) %v245_v39, 16 }
  0xc4   :  { %v3675_v42 = vsel %vm143_vm9, 1.0, %v3460_v5  ;;  %v3678_v43 = vsel %vm142_vm10, 1.0, %v3460_v5  ;;  %vm2751_vm11 = vmpackc.low %vm143_vm9, %vm142_vm10 }
  0xc5   :  { %v154_v44 = vpack.c.bf16 %v3675_v42, %v3678_v43  ;;  %3037 = vmatpush3.bf16.msk.msra.mxu0 %vm2751_vm11, %v3462_v45  ;;  %v2790_v43 = vld [vmem:[%s4168_s25] ss:$0 sm:$0xff] }
  0xc6   :  { %v141_v46 = vpop.permute.xlu1 %140  ;;  %v138_v47 = vpop.permute.xlu0 %137  ;;  %3038 = vmatprep.subr.bf16.mxu0 %v3460_v5 }
  0xc7   :  { %vm145_vm12 = vcmp.eq.s32.totalorder %v3648_v19, %v141_v46  ;;  %vm144_vm13 = vcmp.eq.s32.totalorder %v3648_v19, %v138_v47 }
  0xc8   :  { %v3686_v48 = vsel %vm145_vm12, 1.0, %v3460_v5  ;;  %v3689_v49 = vsel %vm144_vm13, 1.0, %v3460_v5  ;;  %vm2753_vm14 = vmpackc.low %vm145_vm12, %vm144_vm13  ;;  %vm678_vm13 = vcmask 523264  }
  0xc9   :  { %v155_v50 = vpack.c.bf16 %v3686_v48, %v3689_v49  ;;  %3039 = vmatpush3.bf16.msk.msra.mxu0 %vm2753_vm14, %v3462_v45  ;;  %v3307_v48 = vld [vmem:[%s4169_s29 + $0x4] ss:$16 sps:$4 sm:$0xff]   ;;  %v3308_v49 = vld [vmem:[%s4169_s29 + $0x8] ss:$16 sps:$4 sm:$0xff]  }
  0xca   :  { %v195_v51 = vpop.permute.xlu1 %194  ;;  %v192_v52 = vpop.permute.xlu0 %191  ;;  %3052 = vmatprep.subr.bf16.mxu0 %v3460_v5 }
  0xcb   :  { %vm203_vm15 = vcmp.eq.s32.totalorder %v3648_v19, %v195_v51  ;;  %vm202_vm1 = vcmp.eq.s32.totalorder %v3648_v19, %v192_v52 }
  0xcc   :  { %vm2756_vm2 = vmpackc.low %vm203_vm15, %vm202_vm1 }
  0xcd   :  { %3045 = vmatpush3.bf16.msk.msra.mxu1 %vm2756_vm2, %v3462_v45 }
  0xce   :  { %v201_v53 = vpop.permute.xlu1 %200  ;;  %v198_v54 = vpop.permute.xlu0 %197  ;;  %3046 = vmatprep.subr.bf16.mxu1 %v3460_v5 }
  0xcf   :  { %vm205_vm3 = vcmp.eq.s32.totalorder %v3648_v19, %v201_v53  ;;  %vm204_vm4 = vcmp.eq.s32.totalorder %v3648_v19, %v198_v54 }
  0xd0   :  { %vm2758_vm5 = vmpackc.low %vm205_vm3, %vm204_vm4 }
  0xd1   :  { %3047 = vmatpush3.bf16.msk.msra.mxu1 %vm2758_vm5, %v3462_v45  ;;  %v3272_v45 = vld [vmem:[%s3526_s19] sm:$0xff]   ;;  %s4172_s19 = sld [smem:[#allocation14_spill]] }
  0xd2   :  { %3058 = vmatprep.subr.bf16.mxu1 %v3460_v5 }
 0x121   :  { %v254_v55 = vpop.trf.xlu0 }
 0x122   :  { %3041 = vmatmul.mubr.msk.bf16.vlgmr.msra.gmra.mrb[0].mxu0 %vm262_vm6, %v254_v55 }
 0x123   :  { %3054 = vmatprep.mubr.msk.bf16.mxu0 %vm3461_vm0, %v3460_v5  ;;  %3053 = vmatpush3.bf16.msra.mxu0 %v396_v9 }
 0x124   :  { %3064 = vmatprep.subr.bf16.mxu0 %v3460_v5 }
 0x125   :  { %v329_v56 = vpop.trf.xlu1 }
 0x126   :  { %3049 = vmatmul.mubr.msk.bf16.vlgmr.msra.gmra.mrb[0].mxu1 %vm262_vm6, %v329_v56 }
 0x127   :  { %3060 = vmatprep.mubr.msk.bf16.mxu1 %vm3461_vm0, %v3460_v5  ;;  %3059 = vmatpush3.bf16.msra.mxu1 %v3271_v35  ;;  %v3282_v35 = vld [vmem:[%s3546_s12 + $0x18] sm:$0xff]  }
 0x128   :  { %3070 = vmatprep.subr.bf16.mxu1 %v3460_v5 }
 0x1f5   :  { %v300_v57 = vpop.f32.mrb[0].mxu0 }
 0x1f6   :  { %v3042_v58 = vpop.f32.mrb[1].mxu0  ;;  %v308_v59 = vsel %vm307_vm7, %v300_v57, 0.0 }
 0x1f7   :  { %309 = vadd.xlane.f32.xlu0 %v308_v59  ;;  %v303_v60 = vpop.f32.mrb[2].mxu0 }
 0x1f8   :  { %v3043_v61 = vpop.f32.mrb[3].mxu0  ;;  %v311_v62 = vsel %vm307_vm7, %v303_v60, 0.0 }
 0x1f9   :  { %v374_v63 = vpop.f32.mrb[0].mxu1  ;;  %312 = vadd.xlane.f32.xlu1 %v311_v62 }
 0x1fa   :  { %v3050_v0 = vpop.f32.mrb[1].mxu1  ;;  %v381_v1 = vsel %vm307_vm7, %v374_v63, 0.0 }
 0x1fb   :  { %v377_v3 = vpop.f32.mrb[2].mxu1  ;;  %382 = vadd.xlane.f32.xlu0 %v381_v1  ;;  %v3273_v1 = vld [vmem:[%s3536_s30] sm:$0xff]  }
 0x1fc   :  { %v3051_v4 = vpop.f32.mrb[3].mxu1  ;;  %v384_v6 = vsel %vm307_vm7, %v377_v3, 0.0 }
 0x1fd   :  { %v2766_v4 = vld [vmem:[%s3531_s24] ss:$0 sm:$0xff]  ;;  %s4173_s24 = sld [smem:[#allocation12_spill]] }
 0x1ff   :  { %385 = vadd.xlane.f32.xlu0 %v384_v6  ;;  %v3274_v6 = vld [vmem:[%s3536_s30 + $0x8] sm:$0xff]  }
 0x20a   :  { %446 = vrot.lane.b32.xlu1 %v399_v12, %s3463_s0 }
 0x215   :  { %562 = vrot.lane.b32.xlu0 %v396_v9, %s3463_s0 }
 0x284   :  { %v310_v13 = vpop.xlane.xlu0 %309 }
 0x285   :  { %v314_v14 = vmax.f32 %v310_v13, 1.0 }
 0x286   :  { %v313_v15 = vpop.xlane.xlu1 %312 }
 0x287   :  { %3390 = vrcp.f32 %v314_v14  ;;  %v315_v16 = vmax.f32 %v313_v15, 1.0  ;;  %v3275_v14 = vld [vmem:[%s3536_s30 + $0x10] sm:$0xff]  }
 0x288   :  { %v383_v17 = vpop.xlane.xlu0 %382 }
 0x289   :  { %3392 = vrcp.f32 %v315_v16  ;;  %v387_v20 = vmax.f32 %v383_v17, 1.0 }
 0x28a   :  { %v447_v39 = vpop.permute.xlu1 %446 }
 0x28b   :  { %3394 = vrcp.f32 %v387_v20 }
 0x28c   :  { %v386_v21 = vpop.xlane.xlu0 %385 }
 0x28d   :  { %v388_v22 = vmax.f32 %v386_v21, 1.0 }
 0x28f   :  { %3396 = vrcp.f32 %v388_v22 }
 0x290   :  { %v563_v53 = vpop.permute.xlu0 %562 }
 0x291   :  { %v3391_v23 = vpop.eup %3390 }
 0x292   :  { %v317_v25 = vmul.f32 %v3391_v23, %v300_v57  ;;  %v2762_v57 = vld [vmem:[%s3521_s14] ss:$0 sm:$0xff]  ;;  %v3277_v23 = vld [vmem:[%s3536_s30 + $0x18] sm:$0xff]   ;;  %s4171_s14 = sld [smem:[#allocation6_spill]] }
 0x293   :  { %v3393_v24 = vpop.eup %3392 }
 0x294   :  { %v319_v27 = vmul.f32 %v3393_v24, %v303_v60 }
 0x295   :  { %v3395_v29 = vpop.eup %3394 }
 0x296   :  { %v3715_v28 = vpack.c.bf16 %v319_v27, %v317_v25  ;;  %v390_v31 = vmul.f32 %v3395_v29, %v374_v63  ;;  %v3279_v25 = vld [vmem:[%s3536_s30 + $0x20] sm:$0xff]   ;;  %v3281_v27 = vld [vmem:[%s3536_s30 + $0x28] sm:$0xff]  }
 0x297   :  { %v3276_v29 = vld [vmem:[%s3546_s12] sm:$0xff]  }
 0x298   :  { %3055 = vmatmul.mubr.msk.bf16.vlgmr.msra.gmra.mrb[4].mxu0 %vm307_vm7, %v3715_v28 }
 0x299   :  { %v3397_v30 = vpop.eup %3396  ;;  %3065 = vmatpush3.bf16.msra.mxu0 %v399_v12  ;;  %3066 = vmatprep.mubr.msk.bf16.mxu0 %vm3461_vm0, %v3460_v5 }
 0x29a   :  { %v392_v32 = vmul.f32 %v3397_v30, %v377_v3  ;;  %3076 = vmatprep.subr.bf16.mxu0 %v3460_v5  ;;  %v3283_v30 = vld [vmem:[%s3536_s30 + $0x30] sm:$0xff]  }
 0x29c   :  { %v3722_v34 = vpack.c.bf16 %v392_v32, %v390_v31  ;;  %v3278_v31 = vld [vmem:[%s3546_s12 + $0x8] sm:$0xff]   ;;  %v3280_v32 = vld [vmem:[%s3546_s12 + $0x10] sm:$0xff]  }
 0x2a0   :  { %3067 = vmatmul.mubr.msk.bf16.vlgmr.msra.gmra.mrb[8].mxu0 %vm307_vm7, %v3722_v34 }
 0x2a1   :  { %3078 = vmatprep.mubr.msk.bf16.mxu0 %vm3461_vm0, %v3460_v5 }
 0x36b   :  { %v437_v36 = vpop.f32.mrb[4].mxu0 }
 0x36c   :  { %v3056_v37 = vpop.f32.mrb[5].mxu0 }
 0x36d   :  { %v440_v38 = vpop.f32.mrb[6].mxu0  ;;  %v3285_v37 = vld [vmem:[%s3536_s30 + $0x38] sm:$0xff]   ;;  %s4174_s30 = sld [smem:[#allocation13_spill]] }
 0x36e   :  { %v444_v40 = vpack.c.bf16 %v440_v38, %v437_v36  ;;  %v3057_v41 = vpop.f32.mrb[7].mxu0  ;;  %v3284_v36 = vld [vmem:[%s3546_s12 + $0x20] sm:$0xff]   ;;  %v3286_v38 = vld [vmem:[%s3546_s12 + $0x28] sm:$0xff]  }
 0x370   :  { %v451_v46 = vsel %vm448_vm8, %v444_v40, %v447_v39  ;;  %v3287_v39 = vld [vmem:[%s3546_s12 + $0x30] sm:$0xff]   ;;  %v3288_v40 = vld [vmem:[%s3546_s12 + $0x38] sm:$0xff]   ;;  %s4176_s12 = sld [smem:[#allocation15_spill]] }
 0x371   :  { %3061 = vmatmul.mubr.msk.bf16.vlgmr.msra.gmra.mrb[4].mxu1 %vm307_vm7, %v451_v46 }
 0x372   :  { %3071 = vmatpush3.bf16.msra.mxu1 %v3272_v45  ;;  %3072 = vmatprep.mubr.msk.bf16.mxu1 %vm3461_vm0, %v3460_v5 }
 0x373   :  { %v553_v47 = vpop.f32.mrb[8].mxu0  ;;  %3082 = vmatprep.subr.bf16.mxu1 %v3460_v5 }
 0x374   :  { %v3068_v51 = vpop.f32.mrb[9].mxu0 }
 0x375   :  { %v556_v52 = vpop.f32.mrb[10].mxu0 }
 0x376   :  { %v560_v54 = vpack.c.bf16 %v556_v52, %v553_v47  ;;  %v3069_v55 = vpop.f32.mrb[11].mxu0 }
 0x378   :  { %v566_v56 = vsel %vm448_vm8, %v560_v54, %v563_v53 }
 0x379   :  { %3073 = vmatmul.mubr.msk.bf16.vlgmr.msra.gmra.mrb[8].mxu1 %vm307_vm7, %v566_v56 }
 0x37a   :  { %3098 = vmatprep.mubr.msk.bf16.mxu1 %vm3461_vm0, %v3460_v5  ;;  %3083 = vmatpush3.bf16.msra.mxu1 %v3273_v1 }
 0x37b   :  { %3084 = vmatprep.subr.bf16.mxu1 %v3460_v5 }
 0x37e   :  { %3085 = vmatpush3.bf16.msra.mxu1 %v3274_v6 }
 0x37f   :  { %3086 = vmatprep.subr.bf16.mxu1 %v3460_v5 }
 0x382   :  { %3087 = vmatpush3.bf16.msra.mxu1 %v3275_v14 }
 0x383   :  { %3088 = vmatprep.subr.bf16.mxu1 %v3460_v5 }
 0x386   :  { %3089 = vmatpush3.bf16.msra.mxu1 %v3277_v23 }
 0x387   :  { %3090 = vmatprep.subr.bf16.mxu1 %v3460_v5 }
 0x38a   :  { %3091 = vmatpush3.bf16.msra.mxu1 %v3279_v25 }
 0x38b   :  { %3092 = vmatprep.subr.bf16.mxu1 %v3460_v5 }
 0x38e   :  { %3093 = vmatpush3.bf16.msra.mxu1 %v3281_v27 }
 0x38f   :  { %3094 = vmatprep.subr.bf16.mxu1 %v3460_v5 }
 0x392   :  { %3095 = vmatpush3.bf16.msra.mxu1 %v3283_v30 }
 0x393   :  { %3096 = vmatprep.subr.bf16.mxu1 %v3460_v5 }
 0x396   :  { %3097 = vmatpush3.bf16.msra.mxu1 %v3285_v37  ;;  %v3294_v37 = vld [vmem:[%s4165_s9 + $0x18] sm:$0xff]  }
 0x397   :  { %3128 = vmatprep.subr.bf16.mxu1 %v3460_v5 }
 0x444   :  { %v503_v58 = vpop.f32.mrb[4].mxu1 }
 0x445   :  { %v504_v59 = vadd.f32 %v2762_v57, %v503_v58  ;;  %v3062_v60 = vpop.f32.mrb[5].mxu1 }
 0x446   :  { %v506_v61 = vpop.f32.mrb[6].mxu1 }
 0x447   :  { %v512_v62 = vmul.f32 0.01, %v504_v59  ;;  %v507_v63 = vadd.f32 %v2762_v57, %v506_v61  ;;  %v3063_v0 = vpop.f32.mrb[7].mxu1  ;;  %vm510_vm9 = vcmp.gt.f32.partialorder %v504_v59, 0.0  ;;  %v2770_v61 = vld [vmem:[%s3541_s6] ss:$0 sm:$0xff] }
 0x448   :  { %s4175_s6 = sld [smem:[#allocation16_spill]] }
 0x449   :  { %vm511_vm10 = vcmp.gt.f32.partialorder %v507_v63, 0.0  ;;  %v513_v3 = vmul.f32 0.01, %v507_v63  ;;  %v3744_v7 = vsel %vm510_vm9, %v504_v59, %v512_v62 }
 0x44b   :  { %v3746_v8 = vsel %vm511_vm10, %v507_v63, %v513_v3 }
 0x44c   :  { %v618_v9 = vpop.f32.mrb[8].mxu1  ;;  %v632_v10 = vpack.c.bf16 %v3746_v8, %v3744_v7 }
 0x44d   :  { %v619_v11 = vadd.f32 %v2766_v4, %v618_v9  ;;  %v3074_v12 = vpop.f32.mrb[9].mxu1 }
 0x44e   :  { %676 = vrot.lane.b32.xlu1 %v632_v10, %s3464_s5  ;;  %v621_v13 = vpop.f32.mrb[10].mxu1 }
 0x44f   :  { %v627_v15 = vmul.f32 0.01, %v619_v11  ;;  %v622_v16 = vadd.f32 %v2766_v4, %v621_v13  ;;  %v3075_v17 = vpop.f32.mrb[11].mxu1  ;;  %vm625_vm11 = vcmp.gt.f32.partialorder %v619_v11, 0.0 }
 0x451   :  { %vm626_vm12 = vcmp.gt.f32.partialorder %v622_v16, 0.0  ;;  %v628_v20 = vmul.f32 0.01, %v622_v16  ;;  %v3754_v21 = vsel %vm625_vm11, %v619_v11, %v627_v15 }
 0x453   :  { %v3756_v22 = vsel %vm626_vm12, %v622_v16, %v628_v20  ;;  %v3289_v20 = vld [vmem:[%s4165_s9] sm:$0xff]  }
 0x454   :  { %v631_v24 = vpack.c.bf16 %v3756_v22, %v3754_v21 }
 0x456   :  { %844 = vrot.lane.b32.xlu1 %v631_v24, %s3464_s5  ;;  %3077 = vmatpush3.bf16.msra.mxu0 %v631_v24 }
 0x457   :  { %3102 = vmatprep.subr.bf16.mxu0 %v3460_v5 }
 0x459   :  { %3079 = vmatmul.mubr.msk.bf16.vlgmr.msra.gmra.mrb[12].mxu0 %vm307_vm7, %v3715_v28 }
 0x45a   :  { %3103 = vmatpush3.bf16.msra.mxu0 %v632_v10  ;;  %3104 = vmatprep.mubr.msk.bf16.mxu0 %vm3461_vm0, %v3460_v5  ;;  %v2780_v10 = vld [vmem:[%s3551_s20] ss:$0 sm:$0xff] }
 0x45b   :  { %3108 = vmatprep.subr.bf16.mxu0 %v3460_v5 }
 0x461   :  { %3105 = vmatmul.mubr.msk.bf16.vlgmr.msra.gmra.mrb[16].mxu0 %vm307_vm7, %v3722_v34 }
 0x462   :  { %3109 = vmatpush3.bf16.msra.mxu0 %v3276_v29  ;;  %3124 = vmatprep.mubr.msk.bf16.mxu0 %vm3461_vm0, %v3460_v5 }
 0x463   :  { %3110 = vmatprep.subr.bf16.mxu0 %v3460_v5 }
 0x466   :  { %3111 = vmatpush3.bf16.msra.mxu0 %v3278_v31  ;;  %v3290_v31 = vld [vmem:[%s4165_s9 + $0x8] sm:$0xff]  }
 0x467   :  { %3112 = vmatprep.subr.bf16.mxu0 %v3460_v5 }
 0x46a   :  { %3113 = vmatpush3.bf16.msra.mxu0 %v3280_v32 }
 0x46b   :  { %3114 = vmatprep.subr.bf16.mxu0 %v3460_v5 }
 0x46e   :  { %3115 = vmatpush3.bf16.msra.mxu0 %v3282_v35  ;;  %v3292_v35 = vld [vmem:[%s4165_s9 + $0x10] sm:$0xff]  }
 0x46f   :  { %3116 = vmatprep.subr.bf16.mxu0 %v3460_v5 }
 0x472   :  { %3117 = vmatpush3.bf16.msra.mxu0 %v3284_v36  ;;  %v3293_v36 = vld [vmem:[%s4166_s17 + $0x8] sm:$0xff]  }
 0x473   :  { %3118 = vmatprep.subr.bf16.mxu0 %v3460_v5 }
 0x476   :  { %3119 = vmatpush3.bf16.msra.mxu0 %v3286_v38  ;;  %v3295_v38 = vld [vmem:[%s4166_s17 + $0x10] sm:$0xff]  }
 0x477   :  { %3120 = vmatprep.subr.bf16.mxu0 %v3460_v5 }
 0x47a   :  { %3121 = vmatpush3.bf16.msra.mxu0 %v3287_v39  ;;  %v3297_v39 = vld [vmem:[%s4166_s17 + $0x18] sm:$0xff]  }
 0x47b   :  { %3122 = vmatprep.subr.bf16.mxu0 %v3460_v5 }
 0x47e   :  { %3123 = vmatpush3.bf16.msra.mxu0 %v3288_v40  ;;  %v3298_v40 = vld [vmem:[%s4165_s9 + $0x28] sm:$0xff]  }
 0x47f   :  { %3154 = vmatprep.subr.bf16.mxu0 %v3460_v5 }
 0x4c0   :  { %v677_v52 = vpop.permute.xlu1 %676 }
 0x4c8   :  { %v845_v59 = vpop.permute.xlu1 %844 }
 0x52c   :  { %v667_v41 = vpop.f32.mrb[12].mxu0 }
 0x52d   :  { %v3080_v45 = vpop.f32.mrb[13].mxu0 }
 0x52e   :  { %v670_v46 = vpop.f32.mrb[14].mxu0  ;;  %v3300_v45 = vld [vmem:[%s4165_s9 + $0x30] sm:$0xff]  }
 0x52f   :  { %v674_v47 = vpack.c.bf16 %v670_v46, %v667_v41  ;;  %v3081_v51 = vpop.f32.mrb[15].mxu0  ;;  %v3299_v41 = vld [vmem:[%s4166_s17 + $0x20] sm:$0xff]   ;;  %v3301_v46 = vld [vmem:[%s4166_s17 + $0x28] sm:$0xff]  }
 0x530   :  { %v3303_v51 = vld [vmem:[%s4166_s17 + $0x30] sm:$0xff]  }
 0x531   :  { %v681_v53 = vsel %vm678_vm13, %v674_v47, %v677_v52  ;;  %v3302_v47 = vld [vmem:[%s4165_s9 + $0x38] sm:$0xff]  }
 0x532   :  { %3099 = vmatmul.mubr.bf16.vlgmr.msra.gmra.mrb[12].mxu1 %v681_v53  ;;  %v3304_v52 = vld [vmem:[%s4166_s17 + $0x38] sm:$0xff]  }
 0x533   :  { %3130 = vmatprep.mubr.msk.bf16.mxu1 %vm3461_vm0, %v3460_v5 }
 0x534   :  { %v835_v54 = vpop.f32.mrb[16].mxu0 }
 0x535   :  { %v3106_v55 = vpop.f32.mrb[17].mxu0 }
 0x536   :  { %v838_v56 = vpop.f32.mrb[18].mxu0 }
 0x537   :  { %v842_v57 = vpack.c.bf16 %v838_v56, %v835_v54  ;;  %v3107_v58 = vpop.f32.mrb[19].mxu0 }
 0x539   :  { %v848_v60 = vsel %vm678_vm13, %v842_v57, %v845_v59 }
 0x53a   :  { %3125 = vmatmul.mubr.bf16.vlgmr.msra.gmra.mrb[20].mxu0 %v848_v60 }
 0x53b   :  { %3156 = vmatprep.mubr.msk.bf16.mxu0 %vm3461_vm0, %v3460_v5 }
 0x605   :  { %v788_v62 = vpop.f32.mrb[12].mxu1 }
 0x606   :  { %v789_v63 = vadd.f32 %v2770_v61, %v788_v62  ;;  %v3100_v0 = vpop.f32.mrb[13].mxu1 }
 0x607   :  { %v791_v1 = vpop.f32.mrb[14].mxu1 }
 0x608   :  { %v797_v3 = vmul.f32 0.01, %v789_v63  ;;  %v792_v4 = vadd.f32 %v2770_v61, %v791_v1  ;;  %v3101_v6 = vpop.f32.mrb[15].mxu1  ;;  %vm795_vm14 = vcmp.gt.f32.partialorder %v789_v63, 0.0 }
 0x60a   :  { %vm796_vm15 = vcmp.gt.f32.partialorder %v792_v4, 0.0  ;;  %v798_v9 = vmul.f32 0.01, %v792_v4  ;;  %v3806_v11 = vsel %vm795_vm14, %v789_v63, %v797_v3  ;;  %vm2589_vm14 = vcmask 7168  }
 0x60c   :  { %v3808_v12 = vsel %vm796_vm15, %v792_v4, %v798_v9  ;;  %v2800_v4 = vld [vmem:[%s4167_s21] ss:$0 sm:$0xff] }
 0x60d   :  { %v955_v13 = vpop.f32.mrb[20].mxu0  ;;  %v969_v14 = vpack.c.bf16 %v3808_v12, %v3806_v11 }
 0x60e   :  { %v956_v15 = vadd.f32 %v2780_v10, %v955_v13  ;;  %v3126_v16 = vpop.f32.mrb[21].mxu0 }
 0x60f   :  { %1013 = vrot.lane.b32.xlu1 %v969_v14, %s3464_s5  ;;  %v958_v17 = vpop.f32.mrb[22].mxu0  ;;  %3155 = vmatpush3.bf16.msra.mxu0 %v969_v14 }
 0x610   :  { %v964_v23 = vmul.f32 0.01, %v956_v15  ;;  %v959_v24 = vadd.f32 %v2780_v10, %v958_v17  ;;  %v3127_v25 = vpop.f32.mrb[23].mxu0  ;;  %3160 = vmatprep.subr.bf16.mxu0 %v3460_v5  ;;  %vm962_vm1 = vcmp.gt.f32.partialorder %v956_v15, 0.0 }
 0x612   :  { %vm963_vm2 = vcmp.gt.f32.partialorder %v959_v24, 0.0  ;;  %v965_v27 = vmul.f32 0.01, %v959_v24  ;;  %3157 = vmatmul.mubr.msk.bf16.vlgmr.msra.gmra.mrb[24].mxu0 %vm307_vm7, %v3722_v34  ;;  %v3819_v29 = vsel %vm962_vm1, %v956_v15, %v964_v23  ;;  %v3291_v34 = vld [vmem:[%s4166_s17] sm:$0xff]  }
 0x613   :  { %3161 = vmatpush3.bf16.msra.mxu0 %v3289_v20  ;;  %3176 = vmatprep.mubr.msk.bf16.mxu0 %vm3461_vm0, %v3460_v5  ;;  %v1304_v17 = vadd.f32 %v3819_v29, %v3754_v21  ;;  %v1309_v21 = vadd.f32 %v3806_v11, %v3744_v7 }
 0x614   :  { %v3821_v30 = vsel %vm963_vm2, %v959_v24, %v965_v27  ;;  %3162 = vmatprep.subr.bf16.mxu0 %v3460_v5 }
 0x615   :  { %v968_v32 = vpack.c.bf16 %v3821_v30, %v3819_v29  ;;  %v1305_v42 = vadd.f32 %v3821_v30, %v3756_v22  ;;  %v1310_v30 = vadd.f32 %v3808_v12, %v3746_v8  ;;  %v3305_v8 = vld [vmem:[%s4169_s29] ss:$16 sps:$4 sm:$0xff]   ;;  %v3313_v12 = vld [vmem:[%s4169_s29 + $0x24] ss:$16 sps:$4 sm:$0xff]  }
 0x617   :  { %1180 = vrot.lane.b32.xlu0 %v968_v32, %s3464_s5  ;;  %3129 = vmatpush3.bf16.msra.mxu1 %v968_v32 }
 0x618   :  { %3163 = vmatpush3.bf16.msra.mxu0 %v3290_v31  ;;  %3134 = vmatprep.subr.bf16.mxu1 %v3460_v5 }
 0x619   :  { %3164 = vmatprep.subr.bf16.mxu0 %v3460_v5 }
 0x61a   :  { %3131 = vmatmul.mubr.msk.bf16.vlgmr.msra.gmra.mrb[16].mxu1 %vm307_vm7, %v3715_v28  ;;  %v3296_v28 = vld [vmem:[%s4165_s9 + $0x20] sm:$0xff]  }
 0x61b   :  { %3135 = vmatpush3.bf16.msra.mxu1 %v3291_v34  ;;  %3150 = vmatprep.mubr.msk.bf16.mxu1 %vm3461_vm0, %v3460_v5 }
 0x61c   :  { %3165 = vmatpush3.bf16.msra.mxu0 %v3292_v35  ;;  %3136 = vmatprep.subr.bf16.mxu1 %v3460_v5 }
 0x61d   :  { %3166 = vmatprep.subr.bf16.mxu0 %v3460_v5 }
 0x61f   :  { %3137 = vmatpush3.bf16.msra.mxu1 %v3293_v36 }
 0x620   :  { %3167 = vmatpush3.bf16.msra.mxu0 %v3294_v37  ;;  %3138 = vmatprep.subr.bf16.mxu1 %v3460_v5 }
 0x621   :  { %3168 = vmatprep.subr.bf16.mxu0 %v3460_v5 }
 0x623   :  { %3139 = vmatpush3.bf16.msra.mxu1 %v3295_v38 }
 0x624   :  { %3169 = vmatpush3.bf16.msra.mxu0 %v3296_v28  ;;  %3140 = vmatprep.subr.bf16.mxu1 %v3460_v5 }
 0x625   :  { %3170 = vmatprep.subr.bf16.mxu0 %v3460_v5 }
 0x627   :  { %3141 = vmatpush3.bf16.msra.mxu1 %v3297_v39 }
 0x628   :  { %3171 = vmatpush3.bf16.msra.mxu0 %v3298_v40  ;;  %3142 = vmatprep.subr.bf16.mxu1 %v3460_v5  ;;  %v3314_v40 = vld [vmem:[%s4169_s29 + $0x28] ss:$16 sps:$4 sm:$0xff]  }
 0x629   :  { %3172 = vmatprep.subr.bf16.mxu0 %v3460_v5 }
 0x62b   :  { %3143 = vmatpush3.bf16.msra.mxu1 %v3299_v41  ;;  %v3317_v41 = vld [vmem:[%s4169_s29 + $0x40] ss:$16 sps:$4 sm:$0xff]  }
 0x62c   :  { %3173 = vmatpush3.bf16.msra.mxu0 %v3300_v45  ;;  %3144 = vmatprep.subr.bf16.mxu1 %v3460_v5  ;;  %v3319_v45 = vld [vmem:[%s4169_s29 + $0x44] ss:$16 sps:$4 sm:$0xff]  }
 0x62d   :  { %3174 = vmatprep.subr.bf16.mxu0 %v3460_v5 }
 0x62f   :  { %3145 = vmatpush3.bf16.msra.mxu1 %v3301_v46  ;;  %v3320_v46 = vld [vmem:[%s4169_s29 + $0x48] ss:$16 sps:$4 sm:$0xff]  }
 0x630   :  { %3175 = vmatpush3.bf16.msra.mxu0 %v3302_v47  ;;  %3146 = vmatprep.subr.bf16.mxu1 %v3460_v5  ;;  %v3322_v47 = vld [vmem:[%s4169_s29 + $0x4c] ss:$16 sps:$4 sm:$0xff]  }
 0x631   :  { %1696 = vmatprep.subr.bf16.mxu0 %v3307_v48 }
 0x633   :  { %3147 = vmatpush3.bf16.msra.mxu1 %v3303_v51  ;;  %v3323_v51 = vld [vmem:[%s4169_s29 + $0x60] ss:$16 sps:$4 sm:$0xff]  }
 0x634   :  { %3148 = vmatprep.subr.bf16.mxu1 %v3460_v5 }
 0x637   :  { %3149 = vmatpush3.bf16.msra.mxu1 %v3304_v52  ;;  %v3325_v52 = vld [vmem:[%s4169_s29 + $0x64] ss:$16 sps:$4 sm:$0xff]  }
 0x681   :  { %v1014_v1 = vpop.permute.xlu1 %1013 }
 0x689   :  { %v1181_v58 = vpop.permute.xlu0 %1180 }
 0x6e5   :  { %v1171_v53 = vpop.f32.mrb[24].mxu0 }
 0x6e6   :  { %v3158_v54 = vpop.f32.mrb[25].mxu0 }
 0x6e7   :  { %v1174_v55 = vpop.f32.mrb[26].mxu0  ;;  %v3328_v54 = vld [vmem:[%s4169_s29 + $0x6c] ss:$16 sps:$4 sm:$0xff]  }
 0x6e8   :  { %v1178_v56 = vpack.c.bf16 %v1174_v55, %v1171_v53  ;;  %v3159_v57 = vpop.f32.mrb[27].mxu0  ;;  %v3326_v53 = vld [vmem:[%s4169_s29 + $0x68] ss:$16 sps:$4 sm:$0xff]   ;;  %v3329_v55 = vld [vmem:[%s4169_s29 + $0x80] ss:$16 sps:$4 sm:$0xff]  }
 0x6e9   :  { %v3332_v57 = vld [vmem:[%s4169_s29 + $0x88] ss:$16 sps:$4 sm:$0xff]  }
 0x6ea   :  { %v1184_v59 = vsel %vm678_vm13, %v1178_v56, %v1181_v58  ;;  %v3331_v56 = vld [vmem:[%s4169_s29 + $0x84] ss:$16 sps:$4 sm:$0xff]   ;;  %v3334_v58 = vld [vmem:[%s4169_s29 + $0x8c] ss:$16 sps:$4 sm:$0xff]  }
 0x6eb   :  { %3177 = vmatmul.mubr.bf16.vlgmr.msra.gmra.mrb[28].mxu0 %v1184_v59  ;;  %v3337_v59 = vld [vmem:[%s4169_s29 + $0xa4] ss:$16 sps:$4 sm:$0xff]  }
 0x6ec   :  { %1728 = vmatprep.mubr.bf16.mxu0 %v3459_v2  ;;  %1697 = vmatpush1.bf16.msra.mxu0 %v3305_v8 }
 0x6ed   :  { %v1004_v60 = vpop.f32.mrb[16].mxu1  ;;  %1698 = vmatprep.subr.bf16.mxu0 %v3313_v12 }
 0x6ee   :  { %v3132_v61 = vpop.f32.mrb[17].mxu1 }
 0x6ef   :  { %v1007_v62 = vpop.f32.mrb[18].mxu1  ;;  %v3335_v61 = vld [vmem:[%s4169_s29 + $0xa0] ss:$16 sps:$4 sm:$0xff]  }
 0x6f0   :  { %v1011_v63 = vpack.c.bf16 %v1007_v62, %v1004_v60  ;;  %v3133_v0 = vpop.f32.mrb[19].mxu1  ;;  %v3340_v60 = vld [vmem:[%s4169_s29 + $0xac] ss:$16 sps:$4 sm:$0xff]   ;;  %v3338_v62 = vld [vmem:[%s4169_s29 + $0xa8] ss:$16 sps:$4 sm:$0xff]  }
 0x6f1   :  { %v3346_v0 = vld [vmem:[%s4169_s29 + $0xcc] ss:$16 sps:$4 sm:$0xff]  }
 0x6f2   :  { %v1017_v3 = vsel %vm678_vm13, %v1011_v63, %v1014_v1  ;;  %v3343_v63 = vld [vmem:[%s4169_s29 + $0xc4] ss:$16 sps:$4 sm:$0xff]   ;;  %v3341_v1 = vld [vmem:[%s4169_s29 + $0xc0] ss:$16 sps:$4 sm:$0xff]  }
 0x6f3   :  { %3151 = vmatmul.mubr.bf16.vlgmr.msra.gmra.mrb[20].mxu1 %v1017_v3  ;;  %v3344_v3 = vld [vmem:[%s4169_s29 + $0xc8] ss:$16 sps:$4 sm:$0xff]  }
 0x6f4   :  { %3182 = vmatprep.mubr.msk.bf16.mxu1 %vm307_vm7, %v154_v44 }
 0x7be   :  { %v1291_v6 = vpop.f32.mrb[28].mxu0 }
 0x7bf   :  { %v1292_v9 = vadd.f32 %v2800_v4, %v1291_v6  ;;  %v3178_v10 = vpop.f32.mrb[29].mxu0  ;;  %v3352_v6 = vld [vmem:[%s4169_s29 + $0xec] ss:$16 sps:$4 sm:$0xff]  }
 0x7c0   :  { %v1294_v13 = vpop.f32.mrb[30].mxu0  ;;  %v3350_v10 = vld [vmem:[%s4169_s29 + $0xe8] ss:$16 sps:$4 sm:$0xff]  }
 0x7c1   :  { %vm1298_vm3 = vcmp.gt.f32.partialorder %v1292_v9, 0.0  ;;  %v1300_v14 = vmul.f32 0.01, %v1292_v9  ;;  %v1295_v15 = vadd.f32 %v2800_v4, %v1294_v13  ;;  %v3179_v16 = vpop.f32.mrb[31].mxu0  ;;  %v3349_v4 = vld [vmem:[%s4169_s29 + $0xe4] ss:$16 sps:$4 sm:$0xff]  }
 0x7c3   :  { %v1302_v20 = vsel %vm1298_vm3, %v1292_v9, %v1300_v14  ;;  %vm1299_vm4 = vcmp.gt.f32.partialorder %v1295_v15, 0.0  ;;  %v1301_v23 = vmul.f32 0.01, %v1295_v15  ;;  %v3347_v9 = vld [vmem:[%s4169_s29 + $0xe0] ss:$16 sps:$4 sm:$0xff]  }
 0x7c4   :  { %v1306_v44 = vadd.f32 %v1304_v17, %v1302_v20 }
 0x7c5   :  { %v1303_v24 = vsel %vm1299_vm4, %v1295_v15, %v1301_v23 }
 0x7c6   :  { %v1124_v25 = vpop.f32.mrb[20].mxu1  ;;  %v1307_v27 = vadd.f32 %v1305_v42, %v1303_v24 }
 0x7c7   :  { %v1125_v31 = vadd.f32 %v2790_v43, %v1124_v25  ;;  %v3152_v32 = vpop.f32.mrb[21].mxu1 }
 0x7c8   :  { %v1127_v34 = vpop.f32.mrb[22].mxu1  ;;  %v1308_v35 = vpack.c.bf16 %v1307_v27, %v1306_v44  ;;  %v1475_v27 = vld [vmem:[%s4170_s8 + $0x8] sm:$0xff]  ;;  %v1477_v32 = vld [vmem:[%s4170_s8 + $0x18] sm:$0xff] }
 0x7c9   :  { %vm1131_vm5 = vcmp.gt.f32.partialorder %v1125_v31, 0.0  ;;  %v1133_v36 = vmul.f32 0.01, %v1125_v31  ;;  %v1128_v37 = vadd.f32 %v2790_v43, %v1127_v34  ;;  %v3153_v38 = vpop.f32.mrb[23].mxu1  ;;  %v1476_v34 = vld [vmem:[%s4170_s8 + $0x10] sm:$0xff] }
 0x7ca   :  { %3180 = vmatprep.subr.bf16.mxu1 %v1308_v35  ;;  %v2407_v38 = vld [vmem:[%s4171_s14 + $0x10] sm:$0xff] }
 0x7cb   :  { %v1135_v29 = vsel %vm1131_vm5, %v1125_v31, %v1133_v36  ;;  %vm1132_vm8 = vcmp.gt.f32.partialorder %v1128_v37, 0.0  ;;  %v1134_v22 = vmul.f32 0.01, %v1128_v37  ;;  %3181 = vmatpush3.bf16.msra.mxu1 %v1308_v35  ;;  %v1474_v31 = vld [vmem:[%s4170_s8] sm:$0xff]  ;;  %v3937_v35 = vld [vmem:[%s4171_s14 + $0x8] sm:$0xff]  ;;  %vm2546_vm11 = vcmp.eq.s32.totalorder %v2407_v38, 0 }
 0x7cc   :  { %v1311_v28 = vadd.f32 %v1309_v21, %v1135_v29  ;;  %v2405_v36 = vld [vmem:[%s4171_s14] sm:$0xff]  ;;  %vm2545_vm10 = vcmp.eq.s32.totalorder %v3937_v35, 0  ;;  %vm2622_vm1 = vcmp.eq.s32.totalorder %v3937_v35, 1  ;;  %vm2623_vm2 = vcmp.eq.s32.totalorder %v2407_v38, 1 }
 0x7cd   :  { %v1136_v39 = vsel %vm1132_vm8, %v1128_v37, %v1134_v22  ;;  %v2408_v37 = vld [vmem:[%s4171_s14 + $0x18] sm:$0xff]  ;;  %vm2544_vm9 = vcmp.eq.s32.totalorder %v2405_v36, 0  ;;  %v2895_v29 = vsel %vm2545_vm10, 1.0, %v3460_v5  ;;  %v2896_v22 = vsel %vm2546_vm11, 1.0, %v3460_v5 }
 0x7ce   :  { %3183 = vmatmul.mubr.msk.bf16.vlgmr.msra.gmra.mrb[24].mxu1 %vm307_vm7, %v155_v50  ;;  %v1312_v7 = vadd.f32 %v1310_v30, %v1136_v39  ;;  %v3310_v50 = vld [vmem:[%s4169_s29 + $0xc] ss:$16 sps:$4 sm:$0xff]   ;;  %vm2547_vm12 = vcmp.eq.s32.totalorder %v2408_v37, 0  ;;  %v2894_v21 = vsel %vm2544_vm9, 1.0, %v3460_v5  ;;  %vm2621_vm15 = vcmp.eq.s32.totalorder %v2405_v36, 1 }
 0x7cf   :  { %3188 = vmatprep.mubr.msk.bf16.mxu1 %vm307_vm7, %v3656_v26  ;;  %v3311_v26 = vld [vmem:[%s4169_s29 + $0x20] ss:$16 sps:$4 sm:$0xff]   ;;  %v2897_v30 = vsel %vm2547_vm12, 1.0, %v3460_v5  ;;  %vm2624_vm3 = vcmp.eq.s32.totalorder %v2408_v37, 1  ;;  %v2591_v39 = vsel %vm2589_vm14, %v2895_v29, -inf  ;;  %v2898_v8 = vsel %vm2621_vm15, 1.0, %v3460_v5 }
 0x7d0   :  { %v1313_v11 = vpack.c.bf16 %v1312_v7, %v1311_v28  ;;  %1699 = vmatpush1.bf16.msra.mxu0 %v3311_v26  ;;  %v2590_v28 = vsel %vm2589_vm14, %v2894_v21, -inf  ;;  %v2592_v7 = vsel %vm2589_vm14, %v2896_v22, -inf  ;;  %v2899_v48 = vsel %vm2622_vm1, 1.0, %v3460_v5 }
 0x7d1   :  { %1700 = vmatprep.subr.bf16.mxu0 %v3319_v45  ;;  %v2594_v26 = vmax.f32 %v2590_v28, %v2591_v39  ;;  %v2549_v22 = vsel %vm2545_vm10, 1, %v3459_v2  ;;  %v3370_v28 = vld [vmem:[%s4172_s19 + $0xe0] sm:$0xff]  }
 0x7d2   :  { %3186 = vmatprep.subr.bf16.mxu1 %v1313_v11  ;;  %v3371_v39 = vld [vmem:[%s4172_s19 + $0x20] sm:$0xff]  }
 0x7d3   :  { %3187 = vmatpush3.bf16.msra.mxu1 %v1313_v11  ;;  %v2593_v11 = vsel %vm2589_vm14, %v2897_v30, -inf  ;;  %v3369_v30 = vld [vmem:[%s4172_s19 + $0x60] sm:$0xff]  }
 0x7d4   :  { %1749 = vmatprep.subr.bf16.mxu1 %v3310_v50  ;;  %1701 = vmatpush1.bf16.msra.mxu0 %v3317_v41  ;;  %v2901_v50 = vsel %vm2624_vm3, 1.0, %v3460_v5  ;;  %v2595_v12 = vmax.f32 %v2592_v7, %v2593_v11  ;;  %v3372_v7 = vld [vmem:[%s4172_s19 + $0xa0] sm:$0xff]   ;;  %v3374_v11 = vld [vmem:[%s4172_s19 + $0xe8] sm:$0xff]  }
 0x7d5   :  { %1702 = vmatprep.subr.bf16.mxu0 %v3325_v52  ;;  %v2669_v45 = vsel %vm2589_vm14, %v2901_v50, -inf  ;;  %v3380_v50 = vld [vmem:[%s4172_s19 + $0xb0] sm:$0xff]  }
 0x7d6   :  { %3189 = vmatmul.mubr.msk.bf16.vlgmr.msra.gmra.mrb[28].mxu1 %vm307_vm7, %v3665_v33  ;;  %v3316_v33 = vld [vmem:[%s4169_s29 + $0x2c] ss:$16 sps:$4 sm:$0xff]  }
 0x7d7   :  { %1781 = vmatprep.mubr.bf16.mxu1 %v3459_v2  ;;  %1750 = vmatpush1.bf16.msra.mxu1 %v3308_v49  ;;  %v2900_v49 = vsel %vm2623_vm2, 1.0, %v3460_v5 }
 0x7d8   :  { %1751 = vmatprep.subr.bf16.mxu1 %v3316_v33  ;;  %1703 = vmatpush1.bf16.msra.mxu0 %v3323_v51  ;;  %v2667_v33 = vsel %vm2589_vm14, %v2899_v48, -inf  ;;  %v2668_v41 = vsel %vm2589_vm14, %v2900_v49, -inf  ;;  %v3378_v48 = vld [vmem:[%s4172_s19 + $0xf0] sm:$0xff]  }
 0x7d9   :  { %1704 = vmatprep.subr.bf16.mxu0 %v3331_v56  ;;  %v2671_v51 = vmax.f32 %v2668_v41, %v2669_v45  ;;  %v2625_v56 = vsel %vm2621_vm15, 1, %v3459_v2  ;;  %v3379_v49 = vld [vmem:[%s4172_s19 + $0x30] sm:$0xff]   ;;  %v1501_v41 = vshrl.u32 %v128_v18, 7 }
 0x7db   :  { %1752 = vmatpush1.bf16.msra.mxu1 %v3314_v40  ;;  %v2666_v40 = vsel %vm2589_vm14, %v2898_v8, -inf  ;;  %v3375_v8 = vld [vmem:[%s4172_s19 + $0x28] sm:$0xff]   ;;  %v1502_v45 = vsub.s32 0, %v1501_v41 }
 0x7dc   :  { %1753 = vmatprep.subr.bf16.mxu1 %v3322_v47  ;;  %1705 = vmatpush1.bf16.msra.mxu0 %v3329_v55  ;;  %v2670_v47 = vmax.f32 %v2666_v40, %v2667_v33  ;;  %v2551_v55 = vsel %vm2547_vm12, 1, %v3459_v2  ;;  %v3383_v40 = vld [vmem:[%s4172_s19 + $0x38] sm:$0xff]  }
 0x7dd   :  { %1706 = vmatprep.subr.bf16.mxu0 %v3337_v59  ;;  %v2628_v59 = vsel %vm2624_vm3, 1, %v3459_v2  ;;  %v3384_v33 = vld [vmem:[%s4172_s19 + $0xb8] sm:$0xff]   ;;  %vm2538_vm3 = vcmask 123904  }
 0x7de   :  { %v2672_v52 = vmax.f32 %v2670_v47, %v2671_v51  ;;  %v1506_v47 = vsub.s32 1, %v1501_v41  ;;  %v1514_v51 = vsub.s32 3, %v1501_v41 }
 0x7df   :  { %1754 = vmatpush1.bf16.msra.mxu1 %v3320_v46  ;;  %v2596_v46 = vmax.f32 %v2594_v26, %v2595_v12  ;;  %v3381_v26 = vld [vmem:[%s4172_s19 + $0x78] sm:$0xff]  }
 0x7e0   :  { %1755 = vmatprep.subr.bf16.mxu1 %v3328_v54  ;;  %1707 = vmatpush1.bf16.msra.mxu0 %v3335_v61  ;;  %v2550_v54 = vsel %vm2546_vm11, 1, %v3459_v2  ;;  %v3354_v61 = vld [vmem:[%s4172_s19 + $0xc0] sm:$0xff]   ;;  %v3382_v12 = vld [vmem:[%s4172_s19 + $0xf8] sm:$0xff]  }
 0x7e1   :  { %1708 = vmatprep.subr.bf16.mxu0 %v3343_v63  ;;  %v3355_v63 = vld [vmem:[%s4172_s19] sm:$0xff]  }
 0x7e3   :  { %1756 = vmatpush1.bf16.msra.mxu1 %v3326_v53  ;;  %v2548_v53 = vsel %vm2544_vm9, 1, %v3459_v2 }
 0x7e4   :  { %1757 = vmatprep.subr.bf16.mxu1 %v3334_v58  ;;  %1709 = vmatpush1.bf16.msra.mxu0 %v3341_v1  ;;  %v2627_v58 = vsel %vm2623_vm2, 1, %v3459_v2 }
 0x7e5   :  { %1710 = vmatprep.subr.bf16.mxu0 %v3349_v4  ;;  %v3358_v4 = vld [vmem:[%s4172_s19 + $0xc8] sm:$0xff]  }
 0x7e7   :  { %1758 = vmatpush1.bf16.msra.mxu1 %v3332_v57  ;;  %v2626_v57 = vsel %vm2622_vm1, 1, %v3459_v2 }
 0x7e8   :  { %1759 = vmatprep.subr.bf16.mxu1 %v3340_v60  ;;  %1711 = vmatpush1.bf16.msra.mxu0 %v3347_v9  ;;  %v3353_v60 = vld [vmem:[%s4172_s19 + $0x40] sm:$0xff]   ;;  %v3360_v9 = vld [vmem:[%s4172_s19 + $0x88] sm:$0xff]  }
 0x7e9   :  { %2966 = vmatprep.subr.bf16.mxu0 %v3353_v60 }
 0x7eb   :  { %1760 = vmatpush1.bf16.msra.mxu1 %v3338_v62 }
 0x7ec   :  { %1761 = vmatprep.subr.bf16.mxu1 %v3346_v0  ;;  %v3356_v0 = vld [vmem:[%s4172_s19 + $0x80] sm:$0xff]  }
 0x7ef   :  { %1762 = vmatpush1.bf16.msra.mxu1 %v3344_v3  ;;  %v3357_v3 = vld [vmem:[%s4172_s19 + $0x48] sm:$0xff]  }
 0x7f0   :  { %1763 = vmatprep.subr.bf16.mxu1 %v3352_v6  ;;  %v3359_v6 = vld [vmem:[%s4172_s19 + $0x8] sm:$0xff]  }
 0x7f3   :  { %1764 = vmatpush1.bf16.msra.mxu1 %v3350_v10  ;;  %v3361_v10 = vld [vmem:[%s4172_s19 + $0x50] sm:$0xff]  }
 0x7f4   :  { %2994 = vmatprep.subr.bf16.mxu1 %v3354_v61 }
 0x8a1   :  { %v3918_v13 = vpop.f32.mrb[24].mxu1 }
 0x8a2   :  { %v3920_v14 = vpop.f32.mrb[25].mxu1 }
 0x8a3   :  { %v3922_v15 = vpop.f32.mrb[26].mxu1 }
 0x8a4   :  { %v1425_v16 = vpack.c.bf16 %v3922_v15, %v3918_v13  ;;  %v3926_v17 = vpop.f32.mrb[27].mxu1 }
 0x8a5   :  { %v1424_v20 = vpack.c.bf16 %v3926_v17, %v3920_v14  ;;  %v3362_v14 = vld [vmem:[%s4172_s19 + $0xd0] sm:$0xff]  }
 0x8a9   :  { %v3190_v23 = vpop.f32.mrb[28].mxu1 }
 0x8aa   :  { %v1409_v42 = vpop.f32.mrb[29].mxu1 }
 0x8ab   :  { %v3191_v43 = vpop.f32.mrb[30].mxu1 }
 0x8ac   :  { %v1427_v44 = vpack.c.bf16 %v3191_v43, %v3190_v23  ;;  %v1412_v24 = vpop.f32.mrb[31].mxu1  ;;  %v3364_v23 = vld [vmem:[%s4172_s19 + $0x90] sm:$0xff]  }
 0x8ad   :  { %v1426_v25 = vpack.c.bf16 %v1412_v24, %v1409_v42 }
 0x8ae   :  { %1432 = vrot.lane.b32.xlu1 %v1427_v44, %s3464_s5 }
 0x8af   :  { %1430 = vrot.lane.b32.xlu0 %v1426_v25, %s3464_s5 }
 0x8b2   :  { %1486 = vperm.xlu1 %3270, %v1475_v27   ;;  %v3365_v27 = vld [vmem:[%s4172_s19 + $0x58] sm:$0xff]  }
 0x8b3   :  { %1481 = vperm.xlu0 %3269, %v1474_v31   ;;  %v3366_v31 = vld [vmem:[%s4172_s19 + $0xd8] sm:$0xff]  }
 0x8b6   :  { %1496 = vperm.xlu1 %3270, %v1477_v32   ;;  %v3367_v32 = vld [vmem:[%s4172_s19 + $0x18] sm:$0xff]  }
 0x8b7   :  { %1491 = vperm.xlu0 %3269, %v1476_v34  }
 0x8ba   :  { %2413 = vperm.xlu1 %3270, %v3937_v35   ;;  %v3377_v35 = vld [vmem:[%s4172_s19 + $0x70] sm:$0xff]  }
 0x8bb   :  { %2410 = vperm.xlu0 %3269, %v2405_v36   ;;  %v3368_v36 = vld [vmem:[%s4172_s19 + $0x98] sm:$0xff]  }
 0x8be   :  { %2419 = vperm.xlu1 %3270, %v2408_v37  }
 0x8bf   :  { %2416 = vperm.xlu0 %3269, %v2407_v38  }
 0x8e2   :  { %2597 = vmax.xlane.f32.xlu1 %v2596_v46  ;;  %v1510_v46 = vsub.s32 2, %v1501_v41 }
 0x8e6   :  { %2673 = vmax.xlane.f32.xlu1 %v2672_v52  ;;  %v1478_v52 = vld [vmem:[%s4173_s24] sm:$0xf] }
 0x8f7   :  { %2553 = vperm.xlu1 %3270, %v2548_v53   ;;  %v1503_v53 = vrot.slane %v1478_v52, %v1502_v45 }
 0x8fb   :  { %2559 = vperm.xlu1 %3270, %v2550_v54   ;;  %v1511_v54 = vrot.slane %v1478_v52, %v1510_v46 }
 0x8ff   :  { %2562 = vperm.xlu1 %3270, %v2551_v55   ;;  %v1507_v55 = vrot.slane %v1478_v52, %v1506_v47 }
 0x903   :  { %2630 = vperm.xlu1 %3270, %v2625_v56   ;;  %v1515_v56 = vrot.slane %v1478_v52, %v1514_v51 }
 0x907   :  { %2633 = vperm.xlu1 %3270, %v2626_v57   ;;  %v1802_v57 = vld [vmem:[%s4174_s30] sm:$0xf] }
 0x90b   :  { %2636 = vperm.xlu1 %3270, %v2627_v58  }
 0x90f   :  { %2639 = vperm.xlu1 %3270, %v2628_v59  }
 0x920   :  { %v1433_v17 = vpop.permute.xlu1 %1432 }
 0x921   :  { %v1431_v62 = vpop.permute.xlu0 %1430  ;;  %v1440_v42 = vsel %vm678_vm13, %v1425_v16, %v1433_v17 }
 0x922   :  { %v1436_v1 = vsel %vm678_vm13, %v1424_v20, %v1431_v62  ;;  %v3363_v20 = vld [vmem:[%s4172_s19 + $0x10] sm:$0xff]   ;;  %v4055_v62 = vrot.slane %v1802_v57, %v1502_v45 }
 0x923   :  { %1729 = vmatmul.mubr.bf16.vlgmr.msra.gmra.mrb[32].mxu0 %v1436_v1  ;;  %1782 = vmatmul.mubr.bf16.vlgmr.msra.gmra.mrb[32].mxu1 %v1436_v1 }
 0x924   :  { %1738 = vmatprep.mubr.bf16.mxu0 %v3459_v2  ;;  %1791 = vmatprep.mubr.bf16.mxu1 %v3459_v2  ;;  %v3376_v2 = vld [vmem:[%s4172_s19 + $0xa8] sm:$0xff]  }
 0x925   :  { %2967 = vmatpush3.bf16.msra.mxu0 %v3355_v63  ;;  %2995 = vmatpush3.bf16.msra.mxu1 %v3356_v0  ;;  %v4058_v0 = vrot.slane %v1802_v57, %v1510_v46 }
 0x926   :  { %2968 = vmatprep.subr.bf16.mxu0 %v3357_v3  ;;  %2996 = vmatprep.subr.bf16.mxu1 %v3358_v4 }
 0x929   :  { %2969 = vmatpush3.bf16.msra.mxu0 %v3359_v6  ;;  %2997 = vmatpush3.bf16.msra.mxu1 %v3360_v9  ;;  %v4061_v6 = vrot.slane %v1802_v57, %v1506_v47 }
 0x92a   :  { %2970 = vmatprep.subr.bf16.mxu0 %v3361_v10  ;;  %2998 = vmatprep.subr.bf16.mxu1 %v3362_v14  ;;  %v4064_v10 = vrot.slane %v1802_v57, %v1514_v51 }
 0x92b   :  { %1739 = vmatmul.mubr.bf16.gmra.mrb[36].mxu0 %v1440_v42  ;;  %1792 = vmatmul.mubr.bf16.gmra.mrb[36].mxu1 %v1440_v42 }
 0x92d   :  { %2971 = vmatpush3.bf16.msra.mxu0 %v3363_v20  ;;  %2999 = vmatpush3.bf16.msra.mxu1 %v3364_v23 }
 0x92e   :  { %2972 = vmatprep.subr.bf16.mxu0 %v3365_v27  ;;  %3000 = vmatprep.subr.bf16.mxu1 %v3366_v31 }
 0x931   :  { %v4008_v43 = vpop.permute.xlu1 %1486  ;;  %2973 = vmatpush3.bf16.msra.mxu0 %v3367_v32  ;;  %3001 = vmatpush3.bf16.msra.mxu1 %v3368_v36 }
 0x932   :  { %v4010_v44 = vpop.permute.xlu0 %1481  ;;  %2974 = vmatprep.subr.bf16.mxu0 %v3369_v30  ;;  %3002 = vmatprep.subr.bf16.mxu1 %v3370_v28  ;;  %v1524_v58 = vmul.f32 %v1503_v53, %v4008_v43  ;;  %v1526_v59 = vmul.f32 %v1511_v54, %v4008_v43  ;;  %v1525_v60 = vmul.f32 %v1507_v55, %v4008_v43 }
 0x933   :  { %v1527_v61 = vmul.f32 %v1515_v56, %v4008_v43  ;;  %v1520_v18 = vmul.f32 %v1503_v53, %v4010_v44  ;;  %v1522_v63 = vmul.f32 %v1511_v54, %v4010_v44  ;;  %v1521_v4 = vmul.f32 %v1507_v55, %v4010_v44 }
 0x934   :  { %v1523_v9 = vmul.f32 %v1515_v56, %v4010_v44 }
 0x935   :  { %v4012_v24 = vpop.permute.xlu1 %1496  ;;  %2975 = vmatpush3.bf16.msra.mxu0 %v3371_v39  ;;  %3003 = vmatpush3.bf16.msra.mxu1 %v3372_v7 }
 0x936   :  { %v4014_v25 = vpop.permute.xlu0 %1491  ;;  %3004 = vmatprep.subr.bf16.mxu1 %v3374_v11  ;;  %v1532_v42 = vmul.f32 %v1503_v53, %v4012_v24  ;;  %v1534_v43 = vmul.f32 %v1511_v54, %v4012_v24  ;;  %v1533_v31 = vmul.f32 %v1507_v55, %v4012_v24  ;;  %v1535_v32 = vmul.f32 %v1515_v56, %v4012_v24 }
 0x937   :  { %v1528_v24 = vmul.f32 %v1503_v53, %v4014_v25 }
 0x939   :  { %v2414_v13 = vpop.permute.xlu1 %2413  ;;  %3005 = vmatpush3.bf16.msra.mxu1 %v3376_v2  ;;  %v1529_v2 = vmul.f32 %v1507_v55, %v4014_v25 }
 0x93a   :  { %v2411_v15 = vpop.permute.xlu0 %2410  ;;  %vm2422_vm5 = vcmp.eq.s32.totalorder %v3648_v19, %v2414_v13  ;;  %3006 = vmatprep.subr.bf16.mxu1 %v3378_v48 }
 0x93b   :  { %vm2421_vm4 = vcmp.eq.s32.totalorder %v3648_v19, %v2411_v15  ;;  %v2890_v37 = vsel %vm2422_vm5, 1.0, %v3460_v5 }
 0x93c   :  { %v2889_v16 = vsel %vm2421_vm4, 1.0, %v3460_v5  ;;  %vm2615_vm4 = vcmask 254080  }
 0x93d   :  { %2433 = vxpose.xlu0.b32.start [1/4] (short) (narrow) %v2889_v16, 8  ;;  %v2420_v38 = vpop.permute.xlu1 %2419  ;;  %3007 = vmatpush3.bf16.msra.mxu1 %v3380_v50 }
 0x93e   :  { %v2417_v34 = vpop.permute.xlu0 %2416  ;;  %vm2424_vm9 = vcmp.eq.s32.totalorder %v3648_v19, %v2420_v38  ;;  %3008 = vmatprep.subr.bf16.mxu1 %v3382_v12 }
 0x93f   :  { %vm2423_vm8 = vcmp.eq.s32.totalorder %v3648_v19, %v2417_v34  ;;  %v2892_v29 = vsel %vm2424_vm9, 1.0, %v3460_v5  ;;  %v3373_v19 = vld [vmem:[%s4172_s19 + $0x68] sm:$0xff]  }
 0x940   :  { %v2891_v21 = vsel %vm2423_vm8, 1.0, %v3460_v5  ;;  %2976 = vmatprep.subr.bf16.mxu0 %v3373_v19  ;;  %v1530_v19 = vmul.f32 %v1511_v54, %v4014_v25 }
 0x941   :  { %2434 = vxpose.xlu0.b32.cont [2/4] (short) (narrow) %v2890_v37, 8  ;;  %2977 = vmatpush3.bf16.msra.mxu0 %v3375_v8 }
 0x942   :  { %2978 = vmatprep.subr.bf16.mxu0 %v3377_v35  ;;  %3009 = vmatpush3.bf16.msra.mxu1 %v3384_v33  ;;  %v1531_v35 = vmul.f32 %v1515_v56, %v4014_v25 }
 0x945   :  { %2435 = vxpose.xlu0.b32.cont [3/4] (short) (narrow) %v2891_v21, 8  ;;  %2979 = vmatpush3.bf16.msra.mxu0 %v3379_v49 }
 0x946   :  { %2980 = vmatprep.subr.bf16.mxu0 %v3381_v26 }
 0x949   :  { %2436 = vxpose.xlu0.b32.end [4/4] (short) (narrow) %v2892_v29, 8  ;;  %2981 = vmatpush3.bf16.msra.mxu0 %v3383_v40 }
 0x972   :  { %2556 = vperm.xlu0 %3269, %v2549_v22  }
 0x9f6   :  { %v1730_v1 = vpop.f32.mrb[32].mxu0  ;;  %v1783_v3 = vpop.f32.mrb[32].mxu1 }
 0x9f7   :  { %v1731_v14 = vadd.f32 %v1730_v1, %v1520_v18  ;;  %v1784_v17 = vadd.f32 %v1783_v3, %v1522_v63  ;;  %v1732_v20 = vpop.f32.mrb[33].mxu0  ;;  %v1785_v23 = vpop.f32.mrb[33].mxu1 }
 0x9f8   :  { %v1733_v13 = vadd.f32 %v1732_v20, %v1521_v4  ;;  %v1786_v15 = vadd.f32 %v1785_v23, %v1523_v9  ;;  %v1734_v16 = vpop.f32.mrb[34].mxu0  ;;  %v1787_v27 = vpop.f32.mrb[34].mxu1 }
 0x9f9   :  { %v1824_v44 = vadd.f32 %v4055_v62, %v1731_v14  ;;  %v1826_v34 = vadd.f32 %v4058_v0, %v1784_v17  ;;  %v1735_v36 = vadd.f32 %v1734_v16, %v1524_v58  ;;  %v1788_v37 = vadd.f32 %v1787_v27, %v1526_v59  ;;  %v1736_v38 = vpop.f32.mrb[35].mxu0  ;;  %v1789_v21 = vpop.f32.mrb[35].mxu1 }
 0x9fa   :  { %v1825_v29 = vadd.f32 %v4061_v6, %v1733_v13  ;;  %v1827_v22 = vadd.f32 %v4064_v10, %v1786_v15  ;;  %v1737_v30 = vadd.f32 %v1736_v38, %v1525_v60  ;;  %v1790_v28 = vadd.f32 %v1789_v21, %v1527_v61 }
 0x9fb   :  { %v1828_v39 = vadd.f32 %v4055_v62, %v1735_v36  ;;  %v1830_v7 = vadd.f32 %v4058_v0, %v1788_v37  ;;  %v1840_v48 = vmax.f32 %v1824_v44, 0.0  ;;  %v1842_v49 = vmax.f32 %v1826_v34, 0.0 }
 0x9fc   :  { %v1829_v11 = vadd.f32 %v4061_v6, %v1737_v30  ;;  %v1831_v8 = vadd.f32 %v4064_v10, %v1790_v28  ;;  %v1841_v12 = vmax.f32 %v1825_v29, 0.0  ;;  %v1843_v40 = vmax.f32 %v1827_v22, 0.0  ;;  %v3386_v29 = vld [vmem:[%s4175_s6 + $0x8] sm:$0xff]   ;;  %v3387_v28 = vld [vmem:[%s4175_s6 + $0x10] sm:$0xff]  }
 0x9fd   :  { %v1844_v50 = vmax.f32 %v1828_v39, 0.0  ;;  %v1846_v26 = vmax.f32 %v1830_v7, 0.0 }
 0x9fe   :  { %v1845_v33 = vmax.f32 %v1829_v11, 0.0  ;;  %v1847_v41 = vmax.f32 %v1831_v8, 0.0  ;;  %v1740_v45 = vpop.f32.mrb[36].mxu0  ;;  %v1793_v46 = vpop.f32.mrb[36].mxu1 }
 0x9ff   :  { %v1856_v47 = vpack.c.bf16 %v1844_v50, %v1840_v48  ;;  %v1858_v51 = vpack.c.bf16 %v1846_v26, %v1842_v49  ;;  %v1741_v52 = vadd.f32 %v1740_v45, %v1528_v24  ;;  %v1794_v53 = vadd.f32 %v1793_v46, %v1530_v19  ;;  %v1742_v54 = vpop.f32.mrb[37].mxu0  ;;  %v1795_v57 = vpop.f32.mrb[37].mxu1  ;;  %v3388_v24 = vld [vmem:[%s4175_s6 + $0x18] sm:$0xff]  }
 0xa00   :  { %v1743_v58 = vadd.f32 %v1742_v54, %v1529_v2  ;;  %v1796_v55 = vadd.f32 %v1795_v57, %v1531_v35  ;;  %v1744_v59 = vpop.f32.mrb[38].mxu0  ;;  %v1797_v25 = vpop.f32.mrb[38].mxu1  ;;  %v1857_v56 = vpack.c.bf16 %v1845_v33, %v1841_v12  ;;  %v1859_v60 = vpack.c.bf16 %v1847_v41, %v1843_v40  ;;  %v3389_v35 = vld [vmem:[%s3611_s13] sm:$0xff]  }
 0xa01   :  { %v1832_v61 = vadd.f32 %v4055_v62, %v1741_v52  ;;  %v1834_v18 = vadd.f32 %v4058_v0, %v1794_v53  ;;  %v1745_v63 = vadd.f32 %v1744_v59, %v1532_v42  ;;  %v1798_v1 = vadd.f32 %v1797_v25, %v1534_v43  ;;  %v1746_v3 = vpop.f32.mrb[39].mxu0  ;;  %v1799_v4 = vpop.f32.mrb[39].mxu1  ;;  %3204 = vmatprep.subr.bf16.mxu1 %v3389_v35  ;;  %v2845_v33 = vld [vmem:[%s4176_s12] ss:$0 sm:$0xff] }
 0xa02   :  { %v1833_v9 = vadd.f32 %v4061_v6, %v1743_v58  ;;  %v1835_v14 = vadd.f32 %v4064_v10, %v1796_v55  ;;  %v1747_v17 = vadd.f32 %v1746_v3, %v1533_v31  ;;  %v1800_v20 = vadd.f32 %v1799_v4, %v1535_v32  ;;  %2159 = vmatprep.mubr.bf16.mxu0 %v1857_v56 }
 0xa03   :  { %v1836_v23 = vadd.f32 %v4055_v62, %v1745_v63  ;;  %v1838_v13 = vadd.f32 %v4058_v0, %v1798_v1  ;;  %2208 = vmatprep.mubr.bf16.mxu1 %v1859_v60  ;;  %2160 = vmatmul.mubr.bf16.vlgmr.msra.gmra.mrb[40].mxu0 %v1856_v47  ;;  %v1848_v43 = vmax.f32 %v1832_v61, 0.0  ;;  %v1850_v16 = vmax.f32 %v1834_v18, 0.0 }
 0xa04   :  { %v1837_v15 = vadd.f32 %v4061_v6, %v1747_v17  ;;  %v1839_v42 = vadd.f32 %v4064_v10, %v1800_v20  ;;  %2209 = vmatmul.mubr.bf16.vlgmr.msra.gmra.mrb[40].mxu1 %v1858_v51  ;;  %v1849_v34 = vmax.f32 %v1833_v9, 0.0  ;;  %v1851_v31 = vmax.f32 %v1835_v14, 0.0  ;;  %v2598_v6 = vpop.xlane.xlu1 %2597  ;;  %v3385_v10 = vld [vmem:[%s4175_s6] sm:$0xff]  }
 0xa05   :  { %v1852_v27 = vmax.f32 %v1836_v23, 0.0  ;;  %v1854_v44 = vmax.f32 %v1838_v13, 0.0  ;;  %3192 = vmatprep.subr.bf16.mxu0 %v3385_v10  ;;  %v2599_v22 = vrot.slane %v2598_v6, 4  ;;  %3205 = vmatpush3.bf16.msra.mxu1 %v3389_v35 }
 0xa06   :  { %v1853_v32 = vmax.f32 %v1837_v15, 0.0  ;;  %v1855_v36 = vmax.f32 %v1839_v42, 0.0  ;;  %3193 = vmatpush3.bf16.msra.mxu0 %v3385_v10  ;;  %v4100_v10 = vpop.trf.xlu0 }
 0xa07   :  { %v1860_v62 = vpack.c.bf16 %v1852_v27, %v1848_v43  ;;  %v1862_v37 = vpack.c.bf16 %v1854_v44, %v1850_v16  ;;  %3194 = vmatprep.subr.bf16.mxu0 %v3386_v29  ;;  %v2600_v39 = vmax.f32 %v2598_v6, %v2599_v22 }
 0xa08   :  { %v1861_v0 = vpack.c.bf16 %v1853_v32, %v1849_v34  ;;  %v1863_v38 = vpack.c.bf16 %v1855_v36, %v1851_v31  ;;  %v2674_v21 = vpop.xlane.xlu1 %2673 }
 0xa09   :  { %v2675_v30 = vrot.slane %v2674_v21, 4  ;;  %v2601_v19 = vrot.slane %v2600_v39, 2 }
 0xa0a   :  { %2167 = vmatprep.mubr.bf16.mxu0 %v1861_v0  ;;  %2216 = vmatprep.mubr.bf16.mxu1 %v1863_v38 }
 0xa0b   :  { %2168 = vmatmul.mubr.bf16.gmra.mrb[44].mxu0 %v1860_v62  ;;  %v2676_v7 = vmax.f32 %v2674_v21, %v2675_v30  ;;  %v2602_v8 = vmax.f32 %v2600_v39, %v2601_v19  ;;  %v2878_v21 = vld [vmem:[%s3606_s3] ss:$0 sm:$0xff]  ;;  %v2557_v39 = vpop.permute.xlu0 %2556 }
 0xa0c   :  { %2217 = vmatmul.mubr.bf16.gmra.mrb[44].mxu1 %v1862_v37  ;;  %3195 = vmatpush3.bf16.msra.mxu0 %v3386_v29  ;;  %v2554_v36 = vpop.permute.xlu1 %2553  ;;  %vm2565_vm1 = vcmp.eq.s32.totalorder %v2557_v39, 1 }
 0xa0d   :  { %3196 = vmatprep.subr.bf16.mxu0 %v3387_v28  ;;  %v2677_v11 = vrot.slane %v2676_v7, 2  ;;  %v2603_v48 = vrot.slane %v2602_v8, 1  ;;  %vm2564_vm10 = vcmp.eq.s32.totalorder %v2554_v36, 1 }
 0xa0f   :  { %v2678_v2 = vmax.f32 %v2676_v7, %v2677_v11  ;;  %v2604_v50 = vmax.f32 %v2602_v8, %v2603_v48 }
 0xa10   :  { %3197 = vmatpush3.bf16.msra.mxu0 %v3387_v28  ;;  %v2560_v62 = vpop.permute.xlu1 %2559 }
 0xa11   :  { %3198 = vmatprep.subr.bf16.mxu0 %v3388_v24  ;;  %v2679_v49 = vrot.slane %v2678_v2, 1  ;;  %3227 = vpush %v2604_v50  ;;  %vm2566_vm11 = vcmp.eq.s32.totalorder %v2560_v62, 1 }
 0xa13   :  { %v2680_v26 = vmax.f32 %v2678_v2, %v2679_v49 }
 0xa14   :  { %3199 = vmatpush3.bf16.msra.mxu0 %v3388_v24  ;;  %v2563_v37 = vpop.permute.xlu1 %2562 }
 0xa15   :  { %3229 = vpush %v2680_v26 }
 0xa18   :  { %v2631_v0 = vpop.permute.xlu1 %2630 }
 0xa19   :  { %vm2641_vm12 = vcmp.eq.s32.totalorder %v2631_v0, 1 }
 0xa1c   :  { %v2634_v38 = vpop.permute.xlu1 %2633 }
 0xa1d   :  { %vm2642_vm14 = vcmp.eq.s32.totalorder %v2634_v38, 1 }
 0xa20   :  { %v2637_v6 = vpop.permute.xlu1 %2636 }
 0xa24   :  { %v2640_v22 = vpop.permute.xlu1 %2639 }
 0xa25   :  { %vm2644_vm15 = vcmp.eq.s32.totalorder %v2640_v22, 1 }
 0xa42   :  { %s3228_s13 = spop %3227 }
 0xa43   :  { %p2606_p0 = scmp.gt.f32.partialorder %s3228_s13, 0.5 }
 0xa45   :  { %s2607_s20 = scalar_select %p2606_p0, 1, 0 }
 0xa46   :  { %s3230_s3 = spop %3229 }
 0xa47   :  { %p2682_p1 = scmp.gt.f32.partialorder %s3230_s3, 0.5 }
 0xa49   :  { %s2683_s7 = scalar_select %p2682_p1, 1, 0 }
 0xad6   :  { %v2982_v12 = vpop.f32.mrb[40].mxu0 }
 0xad7   :  { %v3010_v40 = vpop.f32.mrb[40].mxu1  ;;  %v2983_v41 = vpop.f32.mrb[41].mxu0 }
 0xad8   :  { %v2984_v45 = vadd.f32 %v2983_v41, %v2982_v12  ;;  %v3011_v46 = vpop.f32.mrb[41].mxu1  ;;  %v2985_v47 = vpop.f32.mrb[42].mxu0 }
 0xad9   :  { %v3012_v51 = vadd.f32 %v3011_v46, %v3010_v40  ;;  %v3013_v52 = vpop.f32.mrb[42].mxu1  ;;  %v2986_v53 = vpop.f32.mrb[43].mxu0 }
 0xada   :  { %v2162_v54 = vadd.f32 %v2984_v45, %v2845_v33  ;;  %v2987_v57 = vadd.f32 %v2986_v53, %v2985_v47  ;;  %v3014_v58 = vpop.f32.mrb[43].mxu1 }
 0xadb   :  { %v3015_v55 = vadd.f32 %v3014_v58, %v3013_v52 }
 0xadc   :  { %v2211_v59 = vadd.f32 %v3012_v51, %v2162_v54  ;;  %v2165_v25 = vadd.f32 %v2987_v57, %v2845_v33 }
 0xade   :  { %v2214_v56 = vadd.f32 %v3015_v55, %v2165_v25  ;;  %v2988_v60 = vpop.f32.mrb[44].mxu0  ;;  %v2225_v63 = vmax.f32 %v2211_v59, 0.0 }
 0xadf   :  { %v3016_v61 = vpop.f32.mrb[44].mxu1  ;;  %v2989_v18 = vpop.f32.mrb[45].mxu0 }
 0xae0   :  { %v2226_v1 = vmax.f32 %v2214_v56, 0.0  ;;  %v2990_v3 = vadd.f32 %v2989_v18, %v2988_v60  ;;  %v3017_v4 = vpop.f32.mrb[45].mxu1  ;;  %v2991_v9 = vpop.f32.mrb[46].mxu0 }
 0xae1   :  { %v3018_v14 = vadd.f32 %v3017_v4, %v3016_v61  ;;  %v3019_v17 = vpop.f32.mrb[46].mxu1  ;;  %v2992_v20 = vpop.f32.mrb[47].mxu0  ;;  %v2608_v4 = vstv %s2607_s20 }
 0xae2   :  { %v2229_v23 = vpack.c.bf16 %v2226_v1, %v2225_v63  ;;  %v2170_v13 = vadd.f32 %v2990_v3, %v2845_v33  ;;  %v2993_v15 = vadd.f32 %v2992_v20, %v2991_v9  ;;  %v3020_v42 = vpop.f32.mrb[47].mxu1  ;;  %v2684_v9 = vstv %s2683_s7 }
 0xae3   :  { %v3021_v43 = vadd.f32 %v3020_v42, %v3019_v17  ;;  %vm2685_vm2 = vcmp.eq.s32.totalorder %v2684_v9, 1 }
 0xae4   :  { %v2219_v16 = vadd.f32 %v3018_v14, %v2170_v13  ;;  %v2173_v27 = vadd.f32 %v2993_v15, %v2845_v33  ;;  %3200 = vmatprep.mubr.msk.bf16.mxu0 %vm678_vm13, %v2229_v23 }
 0xae6   :  { %v2222_v44 = vadd.f32 %v3021_v43, %v2173_v27  ;;  %v2227_v34 = vmax.f32 %v2219_v16, 0.0  ;;  %v3466_v16 = vmov 0.0|0.0   ;;  %v2885_v27 = vld [vmem:[%s3616_s27] ss:$0 sm:$0xff]  ;;  %s3467_s27 = smov [#allocation2]  }
 0xae7   :  { %3221 = vmatprep.subr.bf16.mxu0 %v3466_v16  ;;  %s2698_s11 = sshll.u32 %s3467_s27, 4  ;;  %s2699_s11 = int_to_ptr.vmem [resolvable:$true] %s2698_s11 }
 0xae8   :  { %v2228_v31 = vmax.f32 %v2222_v44, 0.0  ;;  %s3406_s15 = scalar_lea.vmem %s2699_s11, 32  ;;  %p3411_p3 = scmp.lt.s32.totalorder %s2699_s11, %s2699_s11 }
 0xae9   :  { %p3407_p2 = scmp.ne.s32.totalorder %s2699_s11, %s3406_s15  ;;  %p3412_p4 = scmp.lt.s32.totalorder %s3406_s15, %s3406_s15 }
 0xaea   :  { %v2230_v32 = vpack.c.bf16 %v2228_v31, %v2227_v34 }
 0xaeb   :  { %p3413_p5 = por %p3412_p4, %p3411_p3 }
 0xaec   :  { %3201 = vmatmul.mubr.msk.bf16.vlgmr.msra.gmra.mrb[48].mxu0 %vm678_vm13, %v2230_v32  ;;  %vm2643_vm13 = vcmp.eq.s32.totalorder %v2637_v6, 1 }
 0xaed   :  { %3218 = vmatprep.mubr.msk.f32.mxu0 %vm3461_vm0, %v3460_v5  ;;  %vm2567_vm0 = vcmp.eq.s32.totalorder %v2563_v37, 1  ;;  %p3414_p6 = pnand %p3413_p5, %p3407_p2 }
 0xbbf   :  { %v3202_v29 = vpop.f32.mrb[48].mxu0 }
 0xbc0   :  { %v4103_v30 = vadd.f32 %v3202_v29, %v2878_v21  ;;  %v2310_v28 = vpop.f32.mrb[49].mxu0 }
 0xbc1   :  { %v4105_v7 = vadd.f32 %v2878_v21, %v2310_v28  ;;  %v3203_v5 = vpop.f32.mrb[50].mxu0 }
 0xbc2   :  { %v2570_v24 = vsel %vm2566_vm11, %v4103_v30, -3e+38  ;;  %v4108_v19 = vadd.f32 %v3203_v5, %v2878_v21  ;;  %v2313_v11 = vpop.f32.mrb[51].mxu0  ;;  %v2647_v8 = vsel %vm2643_vm13, %v4103_v30, -3e+38 }
 0xbc3   :  { %v2568_v2 = vsel %vm2564_vm10, %v4105_v7, -3e+38  ;;  %v2574_v35 = vsel %vm307_vm7, %v2570_v24, -inf  ;;  %v2645_v49 = vsel %vm2641_vm12, %v4105_v7, -3e+38  ;;  %v4117_v12 = vadd.f32 %v2878_v21, %v2313_v11 }
 0xbc4   :  { %v2571_v48 = vsel %vm2567_vm0, %v4108_v19, -3e+38  ;;  %v2648_v26 = vsel %vm2644_vm15, %v4108_v19, -3e+38  ;;  %v2651_v40 = vsel %vm307_vm7, %v2647_v8, -inf  ;;  %v2572_v33 = vsel %vm307_vm7, %v2568_v2, -inf }
 0xbc5   :  { %v2575_v50 = vsel %vm307_vm7, %v2571_v48, -inf  ;;  %v2652_v45 = vsel %vm307_vm7, %v2648_v26, -inf  ;;  %v2569_v47 = vsel %vm2565_vm1, %v4117_v12, -3e+38  ;;  %v2646_v51 = vsel %vm2642_vm14, %v4117_v12, -3e+38 }
 0xbc6   :  { %v2577_v41 = vmax.f32 %v2574_v35, %v2575_v50  ;;  %v2654_v46 = vmax.f32 %v2651_v40, %v2652_v45  ;;  %v2325_v52 = vpack.c.bf16 %v4117_v12, %v4105_v7  ;;  %v2649_v53 = vsel %vm307_vm7, %v2645_v49, -inf }
 0xbc7   :  { %v2326_v54 = vpack.c.bf16 %v4108_v19, %v4103_v30  ;;  %v2573_v57 = vsel %vm307_vm7, %v2569_v47, -inf  ;;  %v2650_v58 = vsel %vm307_vm7, %v2646_v51, -inf }
 0xbc8   :  { %v2576_v55 = vmax.f32 %v2572_v33, %v2573_v57  ;;  %v2653_v59 = vmax.f32 %v2649_v53, %v2650_v58  ;;  %3206 = vmatprep.mubr.msk.bf16.mxu1 %vm307_vm7, %v2325_v52 }
 0xbc9   :  { %3207 = vmatmul.mubr.msk.bf16.vlgmr.msra.gmra.mrb[48].mxu1 %vm307_vm7, %v2326_v54  ;;  %vm2609_vm7 = vcmp.eq.s32.totalorder %v2608_v4, 1 }
 0xbca   :  { %v2655_v25 = vmax.f32 %v2653_v59, %v2654_v46  ;;  %v2578_v56 = vmax.f32 %v2576_v55, %v2577_v41 }
 0xbcc   :  { %v2656_v60 = vrot.slane %v2655_v25, 4  ;;  %v2579_v61 = vrot.slane %v2578_v56, 4 }
 0xbce   :  { %v2657_v18 = vmax.f32 %v2655_v25, %v2656_v60  ;;  %v2580_v63 = vmax.f32 %v2578_v56, %v2579_v61 }
 0xbd0   :  { %v2658_v1 = vrot.slane %v2657_v18, 2  ;;  %v2581_v3 = vrot.slane %v2580_v63, 2 }
 0xbd2   :  { %v2659_v14 = vmax.f32 %v2657_v18, %v2658_v1  ;;  %v2582_v17 = vmax.f32 %v2580_v63, %v2581_v3 }
 0xbd4   :  { %v2660_v20 = vrot.slane %v2659_v14, 1  ;;  %v2583_v23 = vrot.slane %v2582_v17, 1 }
 0xbd6   :  { %v2661_v13 = vmax.f32 %v2659_v14, %v2660_v20  ;;  %v2584_v15 = vmax.f32 %v2582_v17, %v2583_v23 }
 0xbd8   :  { %v2686_v42 = vsel %vm2685_vm2, %v2661_v13, 0.0  ;;  %v2610_v43 = vsel %vm2609_vm7, %v2584_v15, 0.0 }
 0xbd9   :  { %2688 = vrot.lane.b32.xlu0 %v2686_v42, %s3465_s10  ;;  %2612 = vrot.lane.b32.xlu1 %v2610_v43, %s3465_s10 }
 0xc4b   :  { %v2689_v8 = vpop.permute.xlu0 %2688 }
 0xc9c   :  { %v3208_v44 = vpop.f32.mrb[48].mxu1 }
 0xc9d   :  { %v2391_v34 = vadd.f32 %v3208_v44, %v2885_v27  ;;  %v2382_v31 = vpop.f32.mrb[49].mxu1 }
 0xc9e   :  { %v2383_v32 = vadd.f32 %v2885_v27, %v2382_v31  ;;  %v3209_v36 = vpop.f32.mrb[50].mxu1 }
 0xc9f   :  { %3398 = vtanh.f32 %v2391_v34  ;;  %v2394_v62 = vadd.f32 %v3209_v36, %v2885_v27  ;;  %v2385_v37 = vpop.f32.mrb[51].mxu1 }
 0xca0   :  { %3400 = vtanh.f32 %v2383_v32  ;;  %v2386_v0 = vadd.f32 %v2885_v27, %v2385_v37 }
 0xca1   :  { %3402 = vtanh.f32 %v2394_v62 }
 0xca2   :  { %3404 = vtanh.f32 %v2386_v0 }
 0xca9   :  { %v3399_v38 = vpop.eup %3398 }
 0xcaa   :  { %v3401_v6 = vpop.eup %3400  ;;  %v2403_v22 = vmul.f32 %v3399_v38, %v4103_v30 }
 0xcab   :  { %v3403_v21 = vpop.eup %3402  ;;  %v2401_v39 = vmul.f32 %v3401_v6, %v4105_v7 }
 0xcac   :  { %v3405_v29 = vpop.eup %3404  ;;  %v2404_v28 = vmul.f32 %v3403_v21, %v4108_v19  ;;  %v2613_v19 = vpop.permute.xlu1 %2612 }
 0xcad   :  { %v2402_v5 = vmul.f32 %v3405_v29, %v4117_v12 }
 0xcae   :  { %v3225_v24 = vpack.c.bf16 %v2404_v28, %v2403_v22 }
 0xcaf   :  { %v3222_v11 = vpack.c.bf16 %v2402_v5, %v2401_v39 }
 0xcb1   :  { %3223 = vmatpush3.bf16.msra.mxu0 %v3222_v11 }
 0xcb2   :  { %3224 = vmatprep.subr.bf16.mxu0 %v3466_v16 }
 0xcb5   :  { %3226 = vmatpush3.bf16.msra.mxu0 %v3225_v24 }
 0xcb8   :  { %3219 = vmatmul.mubr.msk.f32.vlgmr.msra.gmra.mrb[52].mxu0 %vm262_vm6, %v4100_v10 }
 0xd8b   :  { %v2534_v30 = vpop.f32.mrb[52].mxu0 }
 0xd8c   :  { %2539 = vst.msk [vmem:[#allocation2] sm:$0x3] %vm2538_vm3, %v2534_v30  ;;  %v3220_v7 = vpop.f32.mrb[53].mxu0 }
 0xd8d   :  { %2616 = vst.msk [vmem:[#allocation2] sm:$0x1] %vm2615_vm4, %v2613_v19  ;;  %2691 = vst.msk [vmem:[#allocation2 + $0x1] sm:$0x1] %vm2615_vm4, %v2689_v8 }
 0xd8e   :  { %3417 = shalt.err (!%p3414_p6)
}
 0xd8f   :  { %s3418_s16 = scalar_lea.hbm %s3621_s4, 32 }
 0xd90   :  { %p3419_p7 = scmp.ne.s32.totalorder %s3621_s4, %s3418_s16  ;;  %p3422_p8 = scmp.lt.u32.totalorder %s3418_s16, %s3621_s4 }
 0xd92   :  { %p3424_p9 = pnand %p3422_p8, %p3419_p7 }
 0xd94   :  { %3427 = shalt.err (!%p3424_p9)
}
 0xd95   :  { %2701 = dma.vmem_to_hbm [thread:$0]  %s2699_s11, 32, %s3621_s4, [#allocation3]  }
 0xd96   :  { %3428 = dma.done.wait [#allocation3], 32  }
 0xd97   :  { %3429 = vsyncadd [#allocation3], 4294967264 }
 0xd98   :  { %2705 = vsyncpa [#allocation3], 1 }

</bundles_post_ra>
